<compile_context>
chip_gen: v5e
topology: v5e:2x2
jax: 0.10.0
libtpu: 0.0.40
codegen_flags: <defaults>
</compile_context>

<pallas_src>
import math
import functools

import jax
import jax.numpy as jnp
from jax.experimental import pallas as pl
from jax.experimental.pallas import tpu as pltpu

_BF16 = jnp.bfloat16
_F32 = jnp.float32


# ---------------------------------------------------------------------------
# In-kernel helpers (f32 math)
# ---------------------------------------------------------------------------
def _layernorm(x, g, b, eps=1e-5):
    mu = jnp.mean(x, axis=-1, keepdims=True)
    var = jnp.mean((x - mu) * (x - mu), axis=-1, keepdims=True)
    return (x - mu) * jax.lax.rsqrt(var + eps) * g + b


def _gelu_tanh(x):
    c = 0.7978845608028654  # sqrt(2/pi)
    return 0.5 * x * (1.0 + jnp.tanh(c * (x + 0.044715 * x * x * x)))


def _split_heads(t, H, Dh):
    # (N, E) -> (H, N, Dh) via static lane slices (proven Mosaic lowering).
    return jnp.stack([t[:, h * Dh:(h + 1) * Dh] for h in range(H)], axis=0)


def _merge_heads(t3, H):
    # (H, N, Dh) -> (N, E)
    return jnp.concatenate([t3[h] for h in range(H)], axis=-1)


# ---------------------------------------------------------------------------
# Fused single-EncoderLayer kernel.  Grid step = (batch b, query tile qi, kv tile)
# ---------------------------------------------------------------------------
def _encoder_layer_kernel(xq_ref, xkv_ref,
                          wq_ref, bq_ref, wk_ref, bk_ref, wv_ref, bv_ref,
                          wo_ref, bo_ref,
                          g1_ref, be1_ref,
                          w1_ref, bf1_ref, w2_ref, bf2_ref,
                          g2_ref, be2_ref,
                          o_ref,
                          q_sc, m_sc, l_sc, acc_sc, *, H):
    kv = pl.program_id(2)
    n_kv = pl.num_programs(2)
    TQ, E = xq_ref.shape
    Dh = E // H

    # ---- init for this (batch, query-tile) KV sweep -------------------------
    @pl.when(kv == 0)
    def _():
        xq_b = xq_ref[...].astype(_BF16)
        # wq/bq have the 1/sqrt(Dh) attention scale pre-folded in the wrapper.
        q = jnp.dot(xq_b, wq_ref[...], preferred_element_type=_F32) + bq_ref[...]
        q_sc[...] = _split_heads(q, H, Dh).astype(_BF16)          # (H, TQ, Dh)
        m_sc[...] = jnp.full(m_sc.shape, -jnp.inf, dtype=m_sc.dtype)
        l_sc[...] = jnp.zeros(l_sc.shape, dtype=l_sc.dtype)
        acc_sc[...] = jnp.zeros(acc_sc.shape, dtype=acc_sc.dtype)

    # ---- online-softmax attention over this KV tile --------------------------
    xkv_b = xkv_ref[...]                                          # (TK, E) bf16
    k = jnp.dot(xkv_b, wk_ref[...], preferred_element_type=_F32) + bk_ref[...]
    v = jnp.dot(xkv_b, wv_ref[...], preferred_element_type=_F32) + bv_ref[...]
    k3 = _split_heads(k, H, Dh).astype(_BF16)                     # (H, TK, Dh)
    v3 = _split_heads(v, H, Dh).astype(_BF16)

    s = jnp.einsum('hqd,hkd->hqk', q_sc[...], k3,
                   preferred_element_type=_F32)                   # (H, TQ, TK) f32
    m_prev = m_sc[...]
    m_new = jnp.maximum(m_prev, jnp.max(s, axis=-1, keepdims=True))
    alpha = jnp.exp(m_prev - m_new)                               # (H, TQ, 1) f32
    p = jnp.exp((s - m_new).astype(_BF16))                        # bf16 exp (EUP)
    l_sc[...] = alpha * l_sc[...] + jnp.sum(p.astype(_F32), axis=-1, keepdims=True)
    acc_sc[...] = alpha * acc_sc[...] + jnp.einsum(
        'hqk,hkd->hqd', p, v3, preferred_element_type=_F32)       # (H, TQ, Dh)
    m_sc[...] = m_new

    # ---- finalize: normalize, O-proj, residual+LN1, FFN, residual+LN2 --------
    @pl.when(kv == n_kv - 1)
    def _():
        o3 = acc_sc[...] * pl.reciprocal(l_sc[...], approx=True)  # (H, TQ, Dh)
        attn = _merge_heads(o3, H)                                # (TQ, E) f32
        attn = jnp.dot(attn.astype(_BF16), wo_ref[...],
                       preferred_element_type=_F32) + bo_ref[...]
        # dropout1 = identity (eval mode)
        y = _layernorm(attn + xq_ref[...], g1_ref[...], be1_ref[...])
        hdn = jnp.dot(y.astype(_BF16), w1_ref[...],
                      preferred_element_type=_F32) + bf1_ref[...]  # (TQ, 4E)
        hdn = _gelu_tanh(hdn)
        out = jnp.dot(hdn.astype(_BF16), w2_ref[...],
                      preferred_element_type=_F32) + bf2_ref[...]  # (TQ, E)
        # dropout2 = identity (eval mode)
        out = _layernorm(out + y, g2_ref[...], be2_ref[...])
        o_ref[...] = out.astype(o_ref.dtype)


# ---------------------------------------------------------------------------
# Wrapper
# ---------------------------------------------------------------------------
def _pick_tile(S, cap):
    for t in range(min(S, cap), 7, -8):
        if S % t == 0:
            return t
    return S  # full-dim fallback (see TODO on padding)


def _tpu_kind():
    try:
        return jax.devices()[0].device_kind.lower()
    except Exception:
        return ""


def prepare_layer_params(p, num_heads):
    """One-time prep: store weights in bf16, fold 1/sqrt(Dh) into Wq/bq.
    Do NOT call per forward pass."""
    E = p["wq"].shape[0]
    scale = 1.0 / math.sqrt(E // num_heads)
    return {
        "wq": (p["wq"] * scale).astype(_BF16), "bq": p["bq"] * scale,
        "wk": p["wk"].astype(_BF16), "bk": p["bk"],
        "wv": p["wv"].astype(_BF16), "bv": p["bv"],
        "wo": p["wo"].astype(_BF16), "bo": p["bo"],
        "ln1_g": p["ln1_g"], "ln1_b": p["ln1_b"],
        "w1": p["w1"].astype(_BF16), "b1": p["b1"],
        "w2": p["w2"].astype(_BF16), "b2": p["b2"],
        "ln2_g": p["ln2_g"], "ln2_b": p["ln2_b"],
    }


def encoder_layer_pallas(x, x_bf16, pp, num_heads):
    B, S, E = x.shape
    Hd = pp["w1"].shape[1]          # expend * E
    Dh = E // num_heads

    kind = _tpu_kind()
    is_v7 = ("v7" in kind) or ("7x" in kind)
    TQ = _pick_tile(S, 128 if is_v7 else 256)   # v7x: 64 MiB VMEM -> smaller tile
    TK = _pick_tile(S, 512)
    nQ, nKV = S // TQ, S // TK

    kernel = functools.partial(_encoder_layer_kernel, H=num_heads)

    def const_spec(shape):
        # Grid-invariant block: single-buffer it (falls back gracefully if the
        # installed jax lacks pipeline_mode / Buffered).
        idx = lambda b, qi, kv: (0,) * len(shape)
        try:
            return pl.BlockSpec(shape, idx, pipeline_mode=pl.Buffered(1))
        except Exception:
            return pl.BlockSpec(shape, idx)

    in_specs = [
        pl.BlockSpec((None, TQ, E), lambda b, qi, kv: (b, qi, 0)),  # queries (f32)
        pl.BlockSpec((None, TK, E), lambda b, qi, kv: (b, kv, 0)),  # keys/values (bf16)
        const_spec((E, E)), const_spec((1, E)),      # Wq (pre-scaled), bq
        const_spec((E, E)), const_spec((1, E)),      # Wk, bk
        const_spec((E, E)), const_spec((1, E)),      # Wv, bv
        const_spec((E, E)), const_spec((1, E)),      # out_proj W, b
        const_spec((1, E)), const_spec((1, E)),      # layernorm1 gamma, beta
        const_spec((E, Hd)), const_spec((1, Hd)),    # ffn W1, b1
        const_spec((Hd, E)), const_spec((1, E)),     # ffn W2, b2
        const_spec((1, E)), const_spec((1, E)),      # layernorm2 gamma, beta
    ]
    out_specs = pl.BlockSpec((None, TQ, E), lambda b, qi, kv: (b, qi, 0))

    scratch_shapes = [
        pltpu.VMEM((num_heads, TQ, Dh), _BF16),      # pre-scaled, head-split Q
        pltpu.VMEM((num_heads, TQ, 1), _F32),        # running row max
        pltpu.VMEM((num_heads, TQ, 1), _F32),        # running row denom
        pltpu.VMEM((num_heads, TQ, Dh), _F32),       # output accumulator
    ]

    # Advisory cost estimate (lets XLA overlap per-layer calls).
    flops = int(2 * B * S * E * (4 * E + 2 * Hd) + 4 * B * S * S * E)
    transcendentals = int(B * num_heads * S * S + B * S * Hd)
    bytes_accessed = int(4 * 2 * B * S * E + 2 * B * S * E
                         + 2 * (4 * E * E + 2 * E * Hd) + 4 * (9 * E + Hd))

    vmem_limit = (40 if is_v7 else 64) * 1024 * 1024

    return pl.pallas_call(
        kernel,
        out_shape=jax.ShapeDtypeStruct((B, S, E), x.dtype),
        grid=(B, nQ, nKV),
        in_specs=in_specs,
        out_specs=out_specs,
        scratch_shapes=scratch_shapes,
        compiler_params=pltpu.CompilerParams(
            dimension_semantics=("parallel", "parallel", "arbitrary"),
            vmem_limit_bytes=vmem_limit),
        cost_estimate=pl.CostEstimate(flops=flops,
                                      transcendentals=transcendentals,
                                      bytes_accessed=bytes_accessed),
    )(x, x_bf16,
      pp["wq"], pp["bq"], pp["wk"], pp["bk"], pp["wv"], pp["bv"],
      pp["wo"], pp["bo"], pp["ln1_g"], pp["ln1_b"],
      pp["w1"], pp["b1"], pp["w2"], pp["b2"], pp["ln2_g"], pp["ln2_b"])


def encoder_pallas(x, prepared_params, num_heads):
    out = x
    for pp in prepared_params:
        out = encoder_layer_pallas(out, out.astype(_BF16), pp, num_heads)
    return out


# ---------------------------------------------------------------------------
# Pure-JAX f32 reference (mirrors the PyTorch forward, eval-mode dropout)
# ---------------------------------------------------------------------------
def _layer_ref(x, p, H):
    B, S, E = x.shape
    Dh = E // H
    q = x @ p["wq"] + p["bq"]
    k = x @ p["wk"] + p["bk"]
    v = x @ p["wv"] + p["bv"]
    q = q.reshape(B, S, H, Dh).transpose(0, 2, 1, 3)
    k = k.reshape(B, S, H, Dh).transpose(0, 2, 1, 3)
    v = v.reshape(B, S, H, Dh).transpose(0, 2, 1, 3)
    s = jnp.einsum("bhqd,bhkd->bhqk", q, k) / math.sqrt(Dh)
    a = jax.nn.softmax(s, axis=-1)
    o = jnp.einsum("bhqk,bhkd->bhqd", a, v).transpose(0, 2, 1, 3).reshape(B, S, E)
    attn = o @ p["wo"] + p["bo"]
    y = attn + x
    mu = y.mean(-1, keepdims=True)
    var = ((y - mu) ** 2).mean(-1, keepdims=True)
    y = (y - mu) * jax.lax.rsqrt(var + 1e-5) * p["ln1_g"] + p["ln1_b"]
    h = _gelu_tanh(y @ p["w1"] + p["b1"])
    out = h @ p["w2"] + p["b2"]
    z = out + y
    mu = z.mean(-1, keepdims=True)
    var = ((z - mu) ** 2).mean(-1, keepdims=True)
    return (z - mu) * jax.lax.rsqrt(var + 1e-5) * p["ln2_g"] + p["ln2_b"]


def encoder_ref(x, params, num_heads):
    out = x
    for p in params:
        out = _layer_ref(out, p, num_heads)
    return out


# ---------------------------------------------------------------------------
# Deterministic parameter init
# ---------------------------------------------------------------------------
def init_params(key, embed_size, expend, num_layers):
    E, Hd = embed_size, expend * embed_size
    params = []
    for l in range(num_layers):
        ks = jax.random.split(jax.random.fold_in(key, l), 12)
        params.append({
            "wq": jax.random.normal(ks[0], (E, E), jnp.float32) * 0.02,
            "bq": jax.random.normal(ks[1], (1, E), jnp.float32) * 0.02,
            "wk": jax.random.normal(ks[2], (E, E), jnp.float32) * 0.02,
            "bk": jax.random.normal(ks[3], (1, E), jnp.float32) * 0.02,
            "wv": jax.random.normal(ks[4], (E, E), jnp.float32) * 0.02,
            "bv": jax.random.normal(ks[5], (1, E), jnp.float32) * 0.02,
            "wo": jax.random.normal(ks[6], (E, E), jnp.float32) * 0.02,
            "bo": jax.random.normal(ks[7], (1, E), jnp.float32) * 0.02,
            "ln1_g": jnp.ones((1, E), jnp.float32),
            "ln1_b": jnp.zeros((1, E), jnp.float32),
            "w1": jax.random.normal(ks[8], (E, Hd), jnp.float32) * 0.02,
            "b1": jax.random.normal(ks[9], (1, Hd), jnp.float32) * 0.02,
            "w2": jax.random.normal(ks[10], (Hd, E), jnp.float32) * 0.02,
            "b2": jax.random.normal(ks[11], (1, E), jnp.float32) * 0.02,
            "ln2_g": jnp.ones((1, E), jnp.float32),
            "ln2_b": jnp.zeros((1, E), jnp.float32),
        })
    return params


if __name__ == "__main__":
    B, S, E = 2, 8, 32            # batch, sequence, embed_size
    H, EXPEND, LAYERS = 4, 4, 2   # num_heads, expend, num_layers (small config)

    key = jax.random.PRNGKey(0)
    kx, kp = jax.random.split(key)
    x = jax.random.normal(kx, (B, S, E), jnp.float32)
    params = init_params(kp, E, EXPEND, LAYERS)
    prepared = [prepare_layer_params(p, H) for p in params]   # one-time bf16 prep

    out = jax.block_until_ready(encoder_pallas(x, prepared, H))
    ref = jax.block_until_ready(encoder_ref(x, params, H))

    assert out.shape == (B, S, E)
    # bf16 matmuls, bf16 exp + approx reciprocal vs f32 reference -> loose tolerance.
    err = float(jnp.max(jnp.abs(out - ref)))
    assert err < 3e-2, f"max abs diff {err}"

    print("KERNEL_OK")
</pallas_src>

<mosaic_0001>
module attributes {stable_mosaic.version = 11 : i64} {
  func.func @_encoder_layer_kernel(%arg0: i32, %arg1: i32, %arg2: i32, %arg3: memref<1x8x32xf32, #tpu.memory_space<vmem>>, %arg4: memref<1x8x32xbf16, #tpu.memory_space<vmem>>, %arg5: memref<32x32xbf16, #tpu.memory_space<vmem>>, %arg6: memref<1x32xf32, #tpu.memory_space<vmem>>, %arg7: memref<32x32xbf16, #tpu.memory_space<vmem>>, %arg8: memref<1x32xf32, #tpu.memory_space<vmem>>, %arg9: memref<32x32xbf16, #tpu.memory_space<vmem>>, %arg10: memref<1x32xf32, #tpu.memory_space<vmem>>, %arg11: memref<32x32xbf16, #tpu.memory_space<vmem>>, %arg12: memref<1x32xf32, #tpu.memory_space<vmem>>, %arg13: memref<1x32xf32, #tpu.memory_space<vmem>>, %arg14: memref<1x32xf32, #tpu.memory_space<vmem>>, %arg15: memref<32x128xbf16, #tpu.memory_space<vmem>>, %arg16: memref<1x128xf32, #tpu.memory_space<vmem>>, %arg17: memref<128x32xbf16, #tpu.memory_space<vmem>>, %arg18: memref<1x32xf32, #tpu.memory_space<vmem>>, %arg19: memref<1x32xf32, #tpu.memory_space<vmem>>, %arg20: memref<1x32xf32, #tpu.memory_space<vmem>>, %arg21: memref<1x8x32xf32, #tpu.memory_space<vmem>>, %arg22: memref<4x8x8xbf16, #tpu.memory_space<vmem>>, %arg23: memref<4x8x1xf32, #tpu.memory_space<vmem>>, %arg24: memref<4x8x1xf32, #tpu.memory_space<vmem>>, %arg25: memref<4x8x8xf32, #tpu.memory_space<vmem>>) attributes {dimension_semantics = [#tpu.dimension_semantics<parallel>, #tpu.dimension_semantics<parallel>, #tpu.dimension_semantics<arbitrary>], iteration_bounds = array<i64: 2, 1, 1>, scalar_prefetch = 0 : i64, scratch_operands = 4 : i64, tpu.core_type = #tpu.core_type<tc>, window_params = [{transform_indices = @transform_0, window_bounds = array<i64: 1, 8, 32>}, {transform_indices = @transform_1, window_bounds = array<i64: 1, 8, 32>}, {pipeline_mode = #tpu.pipeline_mode<synchronous>, transform_indices = @transform_2, window_bounds = array<i64: 32, 32>}, {pipeline_mode = #tpu.pipeline_mode<synchronous>, transform_indices = @transform_3, window_bounds = array<i64: 1, 32>}, {pipeline_mode = #tpu.pipeline_mode<synchronous>, transform_indices = @transform_4, window_bounds = array<i64: 32, 32>}, {pipeline_mode = #tpu.pipeline_mode<synchronous>, transform_indices = @transform_5, window_bounds = array<i64: 1, 32>}, {pipeline_mode = #tpu.pipeline_mode<synchronous>, transform_indices = @transform_6, window_bounds = array<i64: 32, 32>}, {pipeline_mode = #tpu.pipeline_mode<synchronous>, transform_indices = @transform_7, window_bounds = array<i64: 1, 32>}, {pipeline_mode = #tpu.pipeline_mode<synchronous>, transform_indices = @transform_8, window_bounds = array<i64: 32, 32>}, {pipeline_mode = #tpu.pipeline_mode<synchronous>, transform_indices = @transform_9, window_bounds = array<i64: 1, 32>}, {pipeline_mode = #tpu.pipeline_mode<synchronous>, transform_indices = @transform_10, window_bounds = array<i64: 1, 32>}, {pipeline_mode = #tpu.pipeline_mode<synchronous>, transform_indices = @transform_11, window_bounds = array<i64: 1, 32>}, {pipeline_mode = #tpu.pipeline_mode<synchronous>, transform_indices = @transform_12, window_bounds = array<i64: 32, 128>}, {pipeline_mode = #tpu.pipeline_mode<synchronous>, transform_indices = @transform_13, window_bounds = array<i64: 1, 128>}, {pipeline_mode = #tpu.pipeline_mode<synchronous>, transform_indices = @transform_14, window_bounds = array<i64: 128, 32>}, {pipeline_mode = #tpu.pipeline_mode<synchronous>, transform_indices = @transform_15, window_bounds = array<i64: 1, 32>}, {pipeline_mode = #tpu.pipeline_mode<synchronous>, transform_indices = @transform_16, window_bounds = array<i64: 1, 32>}, {pipeline_mode = #tpu.pipeline_mode<synchronous>, transform_indices = @transform_17, window_bounds = array<i64: 1, 32>}, {transform_indices = @transform_18, window_bounds = array<i64: 1, 8, 32>}]} {
    %c0_i32 = arith.constant 0 : i32
    %0 = arith.cmpi eq, %arg2, %c0_i32 : i32
    %1 = arith.extui %0 : i1 to i32
    %c0_i32_0 = arith.constant 0 : i32
    %2 = arith.cmpi ne, %1, %c0_i32_0 : i32
    scf.if %2 {
      %c0_39 = arith.constant 0 : index
      %c0_40 = arith.constant 0 : index
      %c0_41 = arith.constant 0 : index
      %64 = vector.load %arg3[%c0_39, %c0_40, %c0_41] : memref<1x8x32xf32, #tpu.memory_space<vmem>>, vector<1x8x32xf32>
      %65 = vector.shape_cast %64 : vector<1x8x32xf32> to vector<8x32xf32>
      %66 = arith.truncf %65 : vector<8x32xf32> to vector<8x32xbf16>
      %c0_42 = arith.constant 0 : index
      %c0_43 = arith.constant 0 : index
      %67 = vector.load %arg5[%c0_42, %c0_43] : memref<32x32xbf16, #tpu.memory_space<vmem>>, vector<32x32xbf16>
      %cst_44 = arith.constant dense<0.000000e+00> : vector<8x32xf32>
      %68 = tpu.matmul %66, %67, %cst_44 {dimension_numbers = #tpu.dot_dimension_numbers<[1], [0], [0], [1], [0, 0, 1, 1], [], []>} : vector<8x32xbf16>, vector<32x32xbf16>, vector<8x32xf32> -> vector<8x32xf32>
      %c0_45 = arith.constant 0 : index
      %c0_46 = arith.constant 0 : index
      %69 = vector.load %arg6[%c0_45, %c0_46] : memref<1x32xf32, #tpu.memory_space<vmem>>, vector<1x32xf32>
      %70 = vector.broadcast %69 : vector<1x32xf32> to vector<8x32xf32>
      %71 = arith.addf %68, %70 : vector<8x32xf32>
      %72 = vector.extract_strided_slice %71 {offsets = [0, 0], sizes = [8, 8], strides = [1, 1]} : vector<8x32xf32> to vector<8x8xf32>
      %73 = vector.extract_strided_slice %71 {offsets = [0, 8], sizes = [8, 8], strides = [1, 1]} : vector<8x32xf32> to vector<8x8xf32>
      %74 = vector.extract_strided_slice %71 {offsets = [0, 16], sizes = [8, 8], strides = [1, 1]} : vector<8x32xf32> to vector<8x8xf32>
      %75 = vector.extract_strided_slice %71 {offsets = [0, 24], sizes = [8, 8], strides = [1, 1]} : vector<8x32xf32> to vector<8x8xf32>
      %76 = vector.shape_cast %72 : vector<8x8xf32> to vector<1x8x8xf32>
      %77 = vector.shape_cast %73 : vector<8x8xf32> to vector<1x8x8xf32>
      %78 = vector.shape_cast %74 : vector<8x8xf32> to vector<1x8x8xf32>
      %79 = vector.shape_cast %75 : vector<8x8xf32> to vector<1x8x8xf32>
      %80 = tpu.concatenate %76, %77, %78, %79 in 0 : vector<1x8x8xf32>, vector<1x8x8xf32>, vector<1x8x8xf32>, vector<1x8x8xf32> -> vector<4x8x8xf32>
      %81 = arith.truncf %80 : vector<4x8x8xf32> to vector<4x8x8xbf16>
      %c0_47 = arith.constant 0 : index
      %c0_48 = arith.constant 0 : index
      %c0_49 = arith.constant 0 : index
      %82 = vector.load %arg22[%c0_47, %c0_48, %c0_49] : memref<4x8x8xbf16, #tpu.memory_space<vmem>>, vector<4x8x8xbf16>
      tpu.vector_store %arg22[%c0_47, %c0_48, %c0_49], %81 {strides = array<i32>} : memref<4x8x8xbf16, #tpu.memory_space<vmem>>, vector<4x8x8xbf16>,
      %cst_50 = arith.constant 0xFF800000 : f32
      %83 = vector.broadcast %cst_50 : f32 to vector<4x8x1xf32>
      %c0_51 = arith.constant 0 : index
      %c0_52 = arith.constant 0 : index
      %c0_53 = arith.constant 0 : index
      %84 = vector.load %arg23[%c0_51, %c0_52, %c0_53] : memref<4x8x1xf32, #tpu.memory_space<vmem>>, vector<4x8x1xf32>
      tpu.vector_store %arg23[%c0_51, %c0_52, %c0_53], %83 {strides = array<i32>} : memref<4x8x1xf32, #tpu.memory_space<vmem>>, vector<4x8x1xf32>,
      %cst_54 = arith.constant 0.000000e+00 : f32
      %85 = vector.broadcast %cst_54 : f32 to vector<4x8x1xf32>
      %c0_55 = arith.constant 0 : index
      %c0_56 = arith.constant 0 : index
      %c0_57 = arith.constant 0 : index
      %86 = vector.load %arg24[%c0_55, %c0_56, %c0_57] : memref<4x8x1xf32, #tpu.memory_space<vmem>>, vector<4x8x1xf32>
      tpu.vector_store %arg24[%c0_55, %c0_56, %c0_57], %85 {strides = array<i32>} : memref<4x8x1xf32, #tpu.memory_space<vmem>>, vector<4x8x1xf32>,
      %cst_58 = arith.constant 0.000000e+00 : f32
      %87 = vector.broadcast %cst_58 : f32 to vector<4x8x8xf32>
      %c0_59 = arith.constant 0 : index
      %c0_60 = arith.constant 0 : index
      %c0_61 = arith.constant 0 : index
      %88 = vector.load %arg25[%c0_59, %c0_60, %c0_61] : memref<4x8x8xf32, #tpu.memory_space<vmem>>, vector<4x8x8xf32>
      tpu.vector_store %arg25[%c0_59, %c0_60, %c0_61], %87 {strides = array<i32>} : memref<4x8x8xf32, #tpu.memory_space<vmem>>, vector<4x8x8xf32>,
    } else {
    }
    %c0 = arith.constant 0 : index
    %c0_1 = arith.constant 0 : index
    %c0_2 = arith.constant 0 : index
    %3 = vector.load %arg4[%c0, %c0_1, %c0_2] : memref<1x8x32xbf16, #tpu.memory_space<vmem>>, vector<1x8x32xbf16>
    %4 = vector.shape_cast %3 : vector<1x8x32xbf16> to vector<8x32xbf16>
    %c0_3 = arith.constant 0 : index
    %c0_4 = arith.constant 0 : index
    %5 = vector.load %arg7[%c0_3, %c0_4] : memref<32x32xbf16, #tpu.memory_space<vmem>>, vector<32x32xbf16>
    %cst = arith.constant dense<0.000000e+00> : vector<8x32xf32>
    %6 = tpu.matmul %4, %5, %cst {dimension_numbers = #tpu.dot_dimension_numbers<[1], [0], [0], [1], [0, 0, 1, 1], [], []>} : vector<8x32xbf16>, vector<32x32xbf16>, vector<8x32xf32> -> vector<8x32xf32>
    %c0_5 = arith.constant 0 : index
    %c0_6 = arith.constant 0 : index
    %7 = vector.load %arg8[%c0_5, %c0_6] : memref<1x32xf32, #tpu.memory_space<vmem>>, vector<1x32xf32>
    %8 = vector.broadcast %7 : vector<1x32xf32> to vector<8x32xf32>
    %9 = arith.addf %6, %8 : vector<8x32xf32>
    %c0_7 = arith.constant 0 : index
    %c0_8 = arith.constant 0 : index
    %10 = vector.load %arg9[%c0_7, %c0_8] : memref<32x32xbf16, #tpu.memory_space<vmem>>, vector<32x32xbf16>
    %cst_9 = arith.constant dense<0.000000e+00> : vector<8x32xf32>
    %11 = tpu.matmul %4, %10, %cst_9 {dimension_numbers = #tpu.dot_dimension_numbers<[1], [0], [0], [1], [0, 0, 1, 1], [], []>} : vector<8x32xbf16>, vector<32x32xbf16>, vector<8x32xf32> -> vector<8x32xf32>
    %c0_10 = arith.constant 0 : index
    %c0_11 = arith.constant 0 : index
    %12 = vector.load %arg10[%c0_10, %c0_11] : memref<1x32xf32, #tpu.memory_space<vmem>>, vector<1x32xf32>
    %13 = vector.broadcast %12 : vector<1x32xf32> to vector<8x32xf32>
    %14 = arith.addf %11, %13 : vector<8x32xf32>
    %15 = vector.extract_strided_slice %9 {offsets = [0, 0], sizes = [8, 8], strides = [1, 1]} : vector<8x32xf32> to vector<8x8xf32>
    %16 = vector.extract_strided_slice %9 {offsets = [0, 8], sizes = [8, 8], strides = [1, 1]} : vector<8x32xf32> to vector<8x8xf32>
    %17 = vector.extract_strided_slice %9 {offsets = [0, 16], sizes = [8, 8], strides = [1, 1]} : vector<8x32xf32> to vector<8x8xf32>
    %18 = vector.extract_strided_slice %9 {offsets = [0, 24], sizes = [8, 8], strides = [1, 1]} : vector<8x32xf32> to vector<8x8xf32>
    %19 = vector.shape_cast %15 : vector<8x8xf32> to vector<1x8x8xf32>
    %20 = vector.shape_cast %16 : vector<8x8xf32> to vector<1x8x8xf32>
    %21 = vector.shape_cast %17 : vector<8x8xf32> to vector<1x8x8xf32>
    %22 = vector.shape_cast %18 : vector<8x8xf32> to vector<1x8x8xf32>
    %23 = tpu.concatenate %19, %20, %21, %22 in 0 : vector<1x8x8xf32>, vector<1x8x8xf32>, vector<1x8x8xf32>, vector<1x8x8xf32> -> vector<4x8x8xf32>
    %24 = arith.truncf %23 : vector<4x8x8xf32> to vector<4x8x8xbf16>
    %25 = vector.extract_strided_slice %14 {offsets = [0, 0], sizes = [8, 8], strides = [1, 1]} : vector<8x32xf32> to vector<8x8xf32>
    %26 = vector.extract_strided_slice %14 {offsets = [0, 8], sizes = [8, 8], strides = [1, 1]} : vector<8x32xf32> to vector<8x8xf32>
    %27 = vector.extract_strided_slice %14 {offsets = [0, 16], sizes = [8, 8], strides = [1, 1]} : vector<8x32xf32> to vector<8x8xf32>
    %28 = vector.extract_strided_slice %14 {offsets = [0, 24], sizes = [8, 8], strides = [1, 1]} : vector<8x32xf32> to vector<8x8xf32>
    %29 = vector.shape_cast %25 : vector<8x8xf32> to vector<1x8x8xf32>
    %30 = vector.shape_cast %26 : vector<8x8xf32> to vector<1x8x8xf32>
    %31 = vector.shape_cast %27 : vector<8x8xf32> to vector<1x8x8xf32>
    %32 = vector.shape_cast %28 : vector<8x8xf32> to vector<1x8x8xf32>
    %33 = tpu.concatenate %29, %30, %31, %32 in 0 : vector<1x8x8xf32>, vector<1x8x8xf32>, vector<1x8x8xf32>, vector<1x8x8xf32> -> vector<4x8x8xf32>
    %34 = arith.truncf %33 : vector<4x8x8xf32> to vector<4x8x8xbf16>
    %c0_12 = arith.constant 0 : index
    %c0_13 = arith.constant 0 : index
    %c0_14 = arith.constant 0 : index
    %35 = vector.load %arg22[%c0_12, %c0_13, %c0_14] : memref<4x8x8xbf16, #tpu.memory_space<vmem>>, vector<4x8x8xbf16>
    "tpu.trace_start"() <{level = 10 : i32, message = "hqd,hkd->hqk"}> : () -> ()
    %cst_15 = arith.constant dense<0.000000e+00> : vector<4x8x8xf32>
    %36 = tpu.matmul %35, %24, %cst_15 {dimension_numbers = #tpu.dot_dimension_numbers<[2], [2], [1], [1], [0, 0, 0, 1, 1, 1], [0], [0]>} : vector<4x8x8xbf16>, vector<4x8x8xbf16>, vector<4x8x8xf32> -> vector<4x8x8xf32>
    "tpu.trace_stop"() : () -> ()
    %c0_16 = arith.constant 0 : index
    %c0_17 = arith.constant 0 : index
    %c0_18 = arith.constant 0 : index
    %37 = vector.load %arg23[%c0_16, %c0_17, %c0_18] : memref<4x8x1xf32, #tpu.memory_space<vmem>>, vector<4x8x1xf32>
    %cst_19 = arith.constant dense<0xFF800000> : vector<4x8xf32>
    %38 = vector.multi_reduction <maximumf>, %36, %cst_19 [2] : vector<4x8x8xf32> to vector<4x8xf32>
    %39 = vector.shape_cast %38 : vector<4x8xf32> to vector<4x8x1xf32>
    %40 = arith.maximumf %37, %39 : vector<4x8x1xf32>
    %41 = arith.subf %37, %40 : vector<4x8x1xf32>
    %42 = math.exp %41 : vector<4x8x1xf32>
    %43 = vector.broadcast %40 : vector<4x8x1xf32> to vector<4x8x8xf32>
    %44 = arith.subf %36, %43 : vector<4x8x8xf32>
    %45 = arith.truncf %44 : vector<4x8x8xf32> to vector<4x8x8xbf16>
    %46 = math.exp %45 : vector<4x8x8xbf16>
    %c0_20 = arith.constant 0 : index
    %c0_21 = arith.constant 0 : index
    %c0_22 = arith.constant 0 : index
    %47 = vector.load %arg24[%c0_20, %c0_21, %c0_22] : memref<4x8x1xf32, #tpu.memory_space<vmem>>, vector<4x8x1xf32>
    %48 = arith.mulf %42, %47 : vector<4x8x1xf32>
    %49 = arith.extf %46 : vector<4x8x8xbf16> to vector<4x8x8xf32>
    %cst_23 = arith.constant dense<0.000000e+00> : vector<4x8xf32>
    %50 = vector.multi_reduction <add>, %49, %cst_23 [2] : vector<4x8x8xf32> to vector<4x8xf32>
    %51 = vector.shape_cast %50 : vector<4x8xf32> to vector<4x8x1xf32>
    %52 = arith.addf %48, %51 : vector<4x8x1xf32>
    %c0_24 = arith.constant 0 : index
    %c0_25 = arith.constant 0 : index
    %c0_26 = arith.constant 0 : index
    %53 = vector.load %arg24[%c0_24, %c0_25, %c0_26] : memref<4x8x1xf32, #tpu.memory_space<vmem>>, vector<4x8x1xf32>
    tpu.vector_store %arg24[%c0_24, %c0_25, %c0_26], %52 {strides = array<i32>} : memref<4x8x1xf32, #tpu.memory_space<vmem>>, vector<4x8x1xf32>,
    %c0_27 = arith.constant 0 : index
    %c0_28 = arith.constant 0 : index
    %c0_29 = arith.constant 0 : index
    %54 = vector.load %arg25[%c0_27, %c0_28, %c0_29] : memref<4x8x8xf32, #tpu.memory_space<vmem>>, vector<4x8x8xf32>
    %55 = vector.broadcast %42 : vector<4x8x1xf32> to vector<4x8x8xf32>
    %56 = arith.mulf %55, %54 : vector<4x8x8xf32>
    "tpu.trace_start"() <{level = 10 : i32, message = "hqk,hkd->hqd"}> : () -> ()
    %cst_30 = arith.constant dense<0.000000e+00> : vector<4x8x8xf32>
    %57 = tpu.matmul %46, %34, %cst_30 {dimension_numbers = #tpu.dot_dimension_numbers<[2], [1], [1], [2], [0, 0, 0, 1, 1, 2], [0], [0]>} : vector<4x8x8xbf16>, vector<4x8x8xbf16>, vector<4x8x8xf32> -> vector<4x8x8xf32>
    "tpu.trace_stop"() : () -> ()
    %58 = arith.addf %56, %57 : vector<4x8x8xf32>
    %c0_31 = arith.constant 0 : index
    %c0_32 = arith.constant 0 : index
    %c0_33 = arith.constant 0 : index
    %59 = vector.load %arg25[%c0_31, %c0_32, %c0_33] : memref<4x8x8xf32, #tpu.memory_space<vmem>>, vector<4x8x8xf32>
    tpu.vector_store %arg25[%c0_31, %c0_32, %c0_33], %58 {strides = array<i32>} : memref<4x8x8xf32, #tpu.memory_space<vmem>>, vector<4x8x8xf32>,
    %c0_34 = arith.constant 0 : index
    %c0_35 = arith.constant 0 : index
    %c0_36 = arith.constant 0 : index
    %60 = vector.load %arg23[%c0_34, %c0_35, %c0_36] : memref<4x8x1xf32, #tpu.memory_space<vmem>>, vector<4x8x1xf32>
    tpu.vector_store %arg23[%c0_34, %c0_35, %c0_36], %40 {strides = array<i32>} : memref<4x8x1xf32, #tpu.memory_space<vmem>>, vector<4x8x1xf32>,
    %c0_i32_37 = arith.constant 0 : i32
    %61 = arith.cmpi eq, %arg2, %c0_i32_37 : i32
    %62 = arith.extui %61 : i1 to i32
    %c0_i32_38 = arith.constant 0 : i32
    %63 = arith.cmpi ne, %62, %c0_i32_38 : i32
    scf.if %63 {
      %c0_39 = arith.constant 0 : index
      %c0_40 = arith.constant 0 : index
      %c0_41 = arith.constant 0 : index
      %64 = vector.load %arg25[%c0_39, %c0_40, %c0_41] : memref<4x8x8xf32, #tpu.memory_space<vmem>>, vector<4x8x8xf32>
      %c0_42 = arith.constant 0 : index
      %c0_43 = arith.constant 0 : index
      %c0_44 = arith.constant 0 : index
      %65 = vector.load %arg24[%c0_42, %c0_43, %c0_44] : memref<4x8x1xf32, #tpu.memory_space<vmem>>, vector<4x8x1xf32>
      %66 = tpu.reciprocal %65 {approx = true} : vector<4x8x1xf32> -> vector<4x8x1xf32>
      %67 = vector.broadcast %66 : vector<4x8x1xf32> to vector<4x8x8xf32>
      %68 = arith.mulf %64, %67 : vector<4x8x8xf32>
      %69 = vector.extract_strided_slice %68 {offsets = [0, 0, 0], sizes = [1, 8, 8], strides = [1, 1, 1]} : vector<4x8x8xf32> to vector<1x8x8xf32>
      %70 = vector.shape_cast %69 : vector<1x8x8xf32> to vector<8x8xf32>
      %71 = vector.extract_strided_slice %68 {offsets = [1, 0, 0], sizes = [1, 8, 8], strides = [1, 1, 1]} : vector<4x8x8xf32> to vector<1x8x8xf32>
      %72 = vector.shape_cast %71 : vector<1x8x8xf32> to vector<8x8xf32>
      %73 = vector.extract_strided_slice %68 {offsets = [2, 0, 0], sizes = [1, 8, 8], strides = [1, 1, 1]} : vector<4x8x8xf32> to vector<1x8x8xf32>
      %74 = vector.shape_cast %73 : vector<1x8x8xf32> to vector<8x8xf32>
      %75 = vector.extract_strided_slice %68 {offsets = [3, 0, 0], sizes = [1, 8, 8], strides = [1, 1, 1]} : vector<4x8x8xf32> to vector<1x8x8xf32>
      %76 = vector.shape_cast %75 : vector<1x8x8xf32> to vector<8x8xf32>
      %77 = tpu.concatenate %70, %72, %74, %76 in 1 : vector<8x8xf32>, vector<8x8xf32>, vector<8x8xf32>, vector<8x8xf32> -> vector<8x32xf32>
      %78 = arith.truncf %77 : vector<8x32xf32> to vector<8x32xbf16>
      %c0_45 = arith.constant 0 : index
      %c0_46 = arith.constant 0 : index
      %79 = vector.load %arg11[%c0_45, %c0_46] : memref<32x32xbf16, #tpu.memory_space<vmem>>, vector<32x32xbf16>
      %cst_47 = arith.constant dense<0.000000e+00> : vector<8x32xf32>
      %80 = tpu.matmul %78, %79, %cst_47 {dimension_numbers = #tpu.dot_dimension_numbers<[1], [0], [0], [1], [0, 0, 1, 1], [], []>} : vector<8x32xbf16>, vector<32x32xbf16>, vector<8x32xf32> -> vector<8x32xf32>
      %c0_48 = arith.constant 0 : index
      %c0_49 = arith.constant 0 : index
      %81 = vector.load %arg12[%c0_48, %c0_49] : memref<1x32xf32, #tpu.memory_space<vmem>>, vector<1x32xf32>
      %82 = vector.broadcast %81 : vector<1x32xf32> to vector<8x32xf32>
      %83 = arith.addf %80, %82 : vector<8x32xf32>
      %c0_50 = arith.constant 0 : index
      %c0_51 = arith.constant 0 : index
      %c0_52 = arith.constant 0 : index
      %84 = vector.load %arg3[%c0_50, %c0_51, %c0_52] : memref<1x8x32xf32, #tpu.memory_space<vmem>>, vector<1x8x32xf32>
      %85 = vector.shape_cast %84 : vector<1x8x32xf32> to vector<8x32xf32>
      %86 = arith.addf %83, %85 : vector<8x32xf32>
      %c0_53 = arith.constant 0 : index
      %c0_54 = arith.constant 0 : index
      %87 = vector.load %arg13[%c0_53, %c0_54] : memref<1x32xf32, #tpu.memory_space<vmem>>, vector<1x32xf32>
      %c0_55 = arith.constant 0 : index
      %c0_56 = arith.constant 0 : index
      %88 = vector.load %arg14[%c0_55, %c0_56] : memref<1x32xf32, #tpu.memory_space<vmem>>, vector<1x32xf32>
      %cst_57 = arith.constant dense<0.000000e+00> : vector<8xf32>
      %89 = vector.multi_reduction <add>, %86, %cst_57 [1] : vector<8x32xf32> to vector<8xf32>
      %90 = vector.shape_cast %89 : vector<8xf32> to vector<8x1xf32>
      %cst_58 = arith.constant 3.200000e+01 : f32
      %91 = vector.broadcast %cst_58 : f32 to vector<8x1xf32>
      %92 = arith.divf %90, %91 : vector<8x1xf32>
      %93 = vector.broadcast %92 : vector<8x1xf32> to vector<8x32xf32>
      %94 = arith.subf %86, %93 : vector<8x32xf32>
      %95 = vector.broadcast %92 : vector<8x1xf32> to vector<8x32xf32>
      %96 = arith.subf %86, %95 : vector<8x32xf32>
      %97 = arith.mulf %94, %96 : vector<8x32xf32>
      %cst_59 = arith.constant dense<0.000000e+00> : vector<8xf32>
      %98 = vector.multi_reduction <add>, %97, %cst_59 [1] : vector<8x32xf32> to vector<8xf32>
      %99 = vector.shape_cast %98 : vector<8xf32> to vector<8x1xf32>
      %cst_60 = arith.constant 3.200000e+01 : f32
      %100 = vector.broadcast %cst_60 : f32 to vector<8x1xf32>
      %101 = arith.divf %99, %100 : vector<8x1xf32>
      %102 = vector.broadcast %92 : vector<8x1xf32> to vector<8x32xf32>
      %103 = arith.subf %86, %102 : vector<8x32xf32>
      %cst_61 = arith.constant 9.99999974E-6 : f32
      %104 = vector.broadcast %cst_61 : f32 to vector<8x1xf32>
      %105 = arith.addf %101, %104 : vector<8x1xf32>
      %106 = math.rsqrt %105 : vector<8x1xf32>
      %107 = vector.broadcast %106 : vector<8x1xf32> to vector<8x32xf32>
      %108 = arith.mulf %103, %107 : vector<8x32xf32>
      %109 = vector.broadcast %87 : vector<1x32xf32> to vector<8x32xf32>
      %110 = arith.mulf %108, %109 : vector<8x32xf32>
      %111 = vector.broadcast %88 : vector<1x32xf32> to vector<8x32xf32>
      %112 = arith.addf %110, %111 : vector<8x32xf32>
      %113 = arith.truncf %112 : vector<8x32xf32> to vector<8x32xbf16>
      %c0_62 = arith.constant 0 : index
      %c0_63 = arith.constant 0 : index
      %114 = vector.load %arg15[%c0_62, %c0_63] : memref<32x128xbf16, #tpu.memory_space<vmem>>, vector<32x128xbf16>
      %cst_64 = arith.constant dense<0.000000e+00> : vector<8x128xf32>
      %115 = tpu.matmul %113, %114, %cst_64 {dimension_numbers = #tpu.dot_dimension_numbers<[1], [0], [0], [1], [0, 0, 1, 1], [], []>} : vector<8x32xbf16>, vector<32x128xbf16>, vector<8x128xf32> -> vector<8x128xf32>
      %c0_65 = arith.constant 0 : index
      %c0_66 = arith.constant 0 : index
      %116 = vector.load %arg16[%c0_65, %c0_66] : memref<1x128xf32, #tpu.memory_space<vmem>>, vector<1x128xf32>
      %117 = vector.broadcast %116 : vector<1x128xf32> to vector<8x128xf32>
      %118 = arith.addf %115, %117 : vector<8x128xf32>
      %cst_67 = arith.constant 5.000000e-01 : f32
      %119 = vector.broadcast %cst_67 : f32 to vector<8x128xf32>
      %120 = arith.mulf %119, %118 : vector<8x128xf32>
      %cst_68 = arith.constant 4.471500e-02 : f32
      %121 = vector.broadcast %cst_68 : f32 to vector<8x128xf32>
      %122 = arith.mulf %121, %118 : vector<8x128xf32>
      %123 = arith.mulf %122, %118 : vector<8x128xf32>
      %124 = arith.mulf %123, %118 : vector<8x128xf32>
      %125 = arith.addf %118, %124 : vector<8x128xf32>
      %cst_69 = arith.constant 0.797884583 : f32
      %126 = vector.broadcast %cst_69 : f32 to vector<8x128xf32>
      %127 = arith.mulf %126, %125 : vector<8x128xf32>
      %128 = math.tanh %127 : vector<8x128xf32>
      %cst_70 = arith.constant 1.000000e+00 : f32
      %129 = vector.broadcast %cst_70 : f32 to vector<8x128xf32>
      %130 = arith.addf %129, %128 : vector<8x128xf32>
      %131 = arith.mulf %120, %130 : vector<8x128xf32>
      %132 = arith.truncf %131 : vector<8x128xf32> to vector<8x128xbf16>
      %c0_71 = arith.constant 0 : index
      %c0_72 = arith.constant 0 : index
      %133 = vector.load %arg17[%c0_71, %c0_72] : memref<128x32xbf16, #tpu.memory_space<vmem>>, vector<128x32xbf16>
      %cst_73 = arith.constant dense<0.000000e+00> : vector<8x32xf32>
      %134 = tpu.matmul %132, %133, %cst_73 {dimension_numbers = #tpu.dot_dimension_numbers<[1], [0], [0], [1], [0, 0, 1, 1], [], []>} : vector<8x128xbf16>, vector<128x32xbf16>, vector<8x32xf32> -> vector<8x32xf32>
      %c0_74 = arith.constant 0 : index
      %c0_75 = arith.constant 0 : index
      %135 = vector.load %arg18[%c0_74, %c0_75] : memref<1x32xf32, #tpu.memory_space<vmem>>, vector<1x32xf32>
      %136 = vector.broadcast %135 : vector<1x32xf32> to vector<8x32xf32>
      %137 = arith.addf %134, %136 : vector<8x32xf32>
      %138 = arith.addf %137, %112 : vector<8x32xf32>
      %c0_76 = arith.constant 0 : index
      %c0_77 = arith.constant 0 : index
      %139 = vector.load %arg19[%c0_76, %c0_77] : memref<1x32xf32, #tpu.memory_space<vmem>>, vector<1x32xf32>
      %c0_78 = arith.constant 0 : index
      %c0_79 = arith.constant 0 : index
      %140 = vector.load %arg20[%c0_78, %c0_79] : memref<1x32xf32, #tpu.memory_space<vmem>>, vector<1x32xf32>
      %cst_80 = arith.constant dense<0.000000e+00> : vector<8xf32>
      %141 = vector.multi_reduction <add>, %138, %cst_80 [1] : vector<8x32xf32> to vector<8xf32>
      %142 = vector.shape_cast %141 : vector<8xf32> to vector<8x1xf32>
      %cst_81 = arith.constant 3.200000e+01 : f32
      %143 = vector.broadcast %cst_81 : f32 to vector<8x1xf32>
      %144 = arith.divf %142, %143 : vector<8x1xf32>
      %145 = vector.broadcast %144 : vector<8x1xf32> to vector<8x32xf32>
      %146 = arith.subf %138, %145 : vector<8x32xf32>
      %147 = vector.broadcast %144 : vector<8x1xf32> to vector<8x32xf32>
      %148 = arith.subf %138, %147 : vector<8x32xf32>
      %149 = arith.mulf %146, %148 : vector<8x32xf32>
      %cst_82 = arith.constant dense<0.000000e+00> : vector<8xf32>
      %150 = vector.multi_reduction <add>, %149, %cst_82 [1] : vector<8x32xf32> to vector<8xf32>
      %151 = vector.shape_cast %150 : vector<8xf32> to vector<8x1xf32>
      %cst_83 = arith.constant 3.200000e+01 : f32
      %152 = vector.broadcast %cst_83 : f32 to vector<8x1xf32>
      %153 = arith.divf %151, %152 : vector<8x1xf32>
      %154 = vector.broadcast %144 : vector<8x1xf32> to vector<8x32xf32>
      %155 = arith.subf %138, %154 : vector<8x32xf32>
      %cst_84 = arith.constant 9.99999974E-6 : f32
      %156 = vector.broadcast %cst_84 : f32 to vector<8x1xf32>
      %157 = arith.addf %153, %156 : vector<8x1xf32>
      %158 = math.rsqrt %157 : vector<8x1xf32>
      %159 = vector.broadcast %158 : vector<8x1xf32> to vector<8x32xf32>
      %160 = arith.mulf %155, %159 : vector<8x32xf32>
      %161 = vector.broadcast %139 : vector<1x32xf32> to vector<8x32xf32>
      %162 = arith.mulf %160, %161 : vector<8x32xf32>
      %163 = vector.broadcast %140 : vector<1x32xf32> to vector<8x32xf32>
      %164 = arith.addf %162, %163 : vector<8x32xf32>
      %c0_85 = arith.constant 0 : index
      %c0_86 = arith.constant 0 : index
      %c0_87 = arith.constant 0 : index
      %165 = vector.load %arg21[%c0_85, %c0_86, %c0_87] : memref<1x8x32xf32, #tpu.memory_space<vmem>>, vector<1x8x32xf32>
      %166 = vector.shape_cast %165 : vector<1x8x32xf32> to vector<8x32xf32>
      %167 = vector.shape_cast %164 : vector<8x32xf32> to vector<1x8x32xf32>
      tpu.vector_store %arg21[%c0_85, %c0_86, %c0_87], %167 {strides = array<i32>} : memref<1x8x32xf32, #tpu.memory_space<vmem>>, vector<1x8x32xf32>,
    } else {
    }
    return
  }
  func.func @transform_0(%arg0: i32, %arg1: i32, %arg2: i32) -> (i32, i32, i32) {
    %c0_i32 = arith.constant 0 : i32
    %c0_i32_0 = arith.constant 0 : i32
    return %arg0, %arg1, %c0_i32 : i32, i32, i32
  }
  func.func @transform_1(%arg0: i32, %arg1: i32, %arg2: i32) -> (i32, i32, i32) {
    %c0_i32 = arith.constant 0 : i32
    %c0_i32_0 = arith.constant 0 : i32
    return %arg0, %arg2, %c0_i32 : i32, i32, i32
  }
  func.func @transform_2(%arg0: i32, %arg1: i32, %arg2: i32) -> (i32, i32) {
    %c0_i32 = arith.constant 0 : i32
    %c0_i32_0 = arith.constant 0 : i32
    %c0_i32_1 = arith.constant 0 : i32
    return %c0_i32, %c0_i32_0 : i32, i32
  }
  func.func @transform_3(%arg0: i32, %arg1: i32, %arg2: i32) -> (i32, i32) {
    %c0_i32 = arith.constant 0 : i32
    %c0_i32_0 = arith.constant 0 : i32
    %c0_i32_1 = arith.constant 0 : i32
    return %c0_i32, %c0_i32_0 : i32, i32
  }
  func.func @transform_4(%arg0: i32, %arg1: i32, %arg2: i32) -> (i32, i32) {
    %c0_i32 = arith.constant 0 : i32
    %c0_i32_0 = arith.constant 0 : i32
    %c0_i32_1 = arith.constant 0 : i32
    return %c0_i32, %c0_i32_0 : i32, i32
  }
  func.func @transform_5(%arg0: i32, %arg1: i32, %arg2: i32) -> (i32, i32) {
    %c0_i32 = arith.constant 0 : i32
    %c0_i32_0 = arith.constant 0 : i32
    %c0_i32_1 = arith.constant 0 : i32
    return %c0_i32, %c0_i32_0 : i32, i32
  }
  func.func @transform_6(%arg0: i32, %arg1: i32, %arg2: i32) -> (i32, i32) {
    %c0_i32 = arith.constant 0 : i32
    %c0_i32_0 = arith.constant 0 : i32
    %c0_i32_1 = arith.constant 0 : i32
    return %c0_i32, %c0_i32_0 : i32, i32
  }
  func.func @transform_7(%arg0: i32, %arg1: i32, %arg2: i32) -> (i32, i32) {
    %c0_i32 = arith.constant 0 : i32
    %c0_i32_0 = arith.constant 0 : i32
    %c0_i32_1 = arith.constant 0 : i32
    return %c0_i32, %c0_i32_0 : i32, i32
  }
  func.func @transform_8(%arg0: i32, %arg1: i32, %arg2: i32) -> (i32, i32) {
    %c0_i32 = arith.constant 0 : i32
    %c0_i32_0 = arith.constant 0 : i32
    %c0_i32_1 = arith.constant 0 : i32
    return %c0_i32, %c0_i32_0 : i32, i32
  }
  func.func @transform_9(%arg0: i32, %arg1: i32, %arg2: i32) -> (i32, i32) {
    %c0_i32 = arith.constant 0 : i32
    %c0_i32_0 = arith.constant 0 : i32
    %c0_i32_1 = arith.constant 0 : i32
    return %c0_i32, %c0_i32_0 : i32, i32
  }
  func.func @transform_10(%arg0: i32, %arg1: i32, %arg2: i32) -> (i32, i32) {
    %c0_i32 = arith.constant 0 : i32
    %c0_i32_0 = arith.constant 0 : i32
    %c0_i32_1 = arith.constant 0 : i32
    return %c0_i32, %c0_i32_0 : i32, i32
  }
  func.func @transform_11(%arg0: i32, %arg1: i32, %arg2: i32) -> (i32, i32) {
    %c0_i32 = arith.constant 0 : i32
    %c0_i32_0 = arith.constant 0 : i32
    %c0_i32_1 = arith.constant 0 : i32
    return %c0_i32, %c0_i32_0 : i32, i32
  }
  func.func @transform_12(%arg0: i32, %arg1: i32, %arg2: i32) -> (i32, i32) {
    %c0_i32 = arith.constant 0 : i32
    %c0_i32_0 = arith.constant 0 : i32
    %c0_i32_1 = arith.constant 0 : i32
    return %c0_i32, %c0_i32_0 : i32, i32
  }
  func.func @transform_13(%arg0: i32, %arg1: i32, %arg2: i32) -> (i32, i32) {
    %c0_i32 = arith.constant 0 : i32
    %c0_i32_0 = arith.constant 0 : i32
    %c0_i32_1 = arith.constant 0 : i32
    return %c0_i32, %c0_i32_0 : i32, i32
  }
  func.func @transform_14(%arg0: i32, %arg1: i32, %arg2: i32) -> (i32, i32) {
    %c0_i32 = arith.constant 0 : i32
    %c0_i32_0 = arith.constant 0 : i32
    %c0_i32_1 = arith.constant 0 : i32
    return %c0_i32, %c0_i32_0 : i32, i32
  }
  func.func @transform_15(%arg0: i32, %arg1: i32, %arg2: i32) -> (i32, i32) {
    %c0_i32 = arith.constant 0 : i32
    %c0_i32_0 = arith.constant 0 : i32
    %c0_i32_1 = arith.constant 0 : i32
    return %c0_i32, %c0_i32_0 : i32, i32
  }
  func.func @transform_16(%arg0: i32, %arg1: i32, %arg2: i32) -> (i32, i32) {
    %c0_i32 = arith.constant 0 : i32
    %c0_i32_0 = arith.constant 0 : i32
    %c0_i32_1 = arith.constant 0 : i32
    return %c0_i32, %c0_i32_0 : i32, i32
  }
  func.func @transform_17(%arg0: i32, %arg1: i32, %arg2: i32) -> (i32, i32) {
    %c0_i32 = arith.constant 0 : i32
    %c0_i32_0 = arith.constant 0 : i32
    %c0_i32_1 = arith.constant 0 : i32
    return %c0_i32, %c0_i32_0 : i32, i32
  }
  func.func @transform_18(%arg0: i32, %arg1: i32, %arg2: i32) -> (i32, i32, i32) {
    %c0_i32 = arith.constant 0 : i32
    %c0_i32_0 = arith.constant 0 : i32
    return %arg0, %arg1, %c0_i32 : i32, i32, i32
  }
}

</mosaic_0001>

<bundles_post_ra>
// kernel: tpu_custom_call.1
= control target key start
LH: loop header
LB: loop body
LE: loop exit
PB: predicated region body
PF: predicated region fallthrough
CT: control target
= control target key end

     0   :  { %s2441_s0 = inlined_call_operand.vmem [shape: f32[2,8,32], index: 0, kind: input, shape index: {}]   ;;  %s2442_s1 = inlined_call_operand.hbm [shape: bf16[2,8,32], index: 1, kind: input, shape index: {}]   ;;  %s2443_s2 = inlined_call_operand.vmem [shape: bf16[32,32], index: 2, kind: input, shape index: {}]   ;;  %s2444_s3 = inlined_call_operand.vmem [shape: f32[1,32], index: 3, kind: input, shape index: {}]   ;;  %s2445_s4 = inlined_call_operand.vmem [shape: bf16[32,32], index: 4, kind: input, shape index: {}]   ;;  %s2446_s5 = inlined_call_operand.vmem [shape: f32[1,32], index: 5, kind: input, shape index: {}]   ;;  %s2447_s6 = inlined_call_operand.vmem [shape: bf16[32,32], index: 6, kind: input, shape index: {}]   ;;  %s2448_s7 = inlined_call_operand.vmem [shape: f32[1,32], index: 7, kind: input, shape index: {}]   ;;  %s2449_s8 = inlined_call_operand.vmem [shape: bf16[32,32], index: 8, kind: input, shape index: {}]   ;;  %s2450_s9 = inlined_call_operand.vmem [shape: f32[1,32], index: 9, kind: input, shape index: {}]   ;;  %s2451_s10 = inlined_call_operand.vmem [shape: f32[1,32], index: 10, kind: input, shape index: {}]   ;;  %s2452_s11 = inlined_call_operand.vmem [shape: f32[1,32], index: 11, kind: input, shape index: {}]   ;;  %s2453_s12 = inlined_call_operand.hbm [shape: bf16[32,128], index: 12, kind: input, shape index: {}]   ;;  %s2454_s13 = inlined_call_operand.vmem [shape: f32[1,128], index: 13, kind: input, shape index: {}]   ;;  %s2455_s14 = inlined_call_operand.vmem [shape: bf16[128,32], index: 14, kind: input, shape index: {}]   ;;  %s2456_s15 = inlined_call_operand.vmem [shape: f32[1,32], index: 15, kind: input, shape index: {}]   ;;  %s2457_s16 = inlined_call_operand.vmem [shape: f32[1,32], index: 16, kind: input, shape index: {}]   ;;  %s2458_s17 = inlined_call_operand.vmem [shape: f32[1,32], index: 17, kind: input, shape index: {}]   ;;  %s2459_s18 = inlined_call_operand.hbm [shape: f32[2,8,32], index: 18, kind: output, shape index: {}]  }
   0x1   :  { %2465 = sst [smem:[#allocation19_spill]] %s2441_s0 }
   0x2   :  { %2466 = sst [smem:[#allocation20_spill]] %s2442_s1 }
   0x3   :  { %2467 = sst [smem:[#allocation21_spill]] %s2443_s2 }
   0x4   :  { %2468 = sst [smem:[#allocation22_spill]] %s2451_s10 }
   0x5   :  { %2469 = sst [smem:[#allocation23_spill]] %s2452_s11 }
   0x6   :  { %2470 = sst [smem:[#allocation24_spill]] %s2453_s12 }
   0x7   :  { %2471 = sst [smem:[#allocation25_spill]] %s2454_s13 }
   0x8   :  { %2472 = sst [smem:[#allocation26_spill]] %s2456_s15 }
   0x9   :  { %2473 = sst [smem:[#allocation27_spill]] %s2457_s16 }
   0xa   :  { %2474 = sst [smem:[#allocation28_spill]] %s2458_s17 }
   0xb   :  { %2475 = sst [smem:[#allocation29_spill]] %s2459_s18 }
   0xc   :  { %23 = vsyncpa [#allocation7], 0 }
   0xd   :  { %25 = vsyncpa [#allocation7 + $0x1], 0 }
   0xe   :  { %26 = vsyncpa [#allocation10], 0 }
   0xf   :  { %27 = vsyncpa [#allocation8], 0 }
  0x10   :  { %29 = vsyncpa [#allocation8 + $0x1], 0  ;;  %s2086_s27 = smov 0   ;;  %s2088_s28 = smov 0  }
  0x11   :  { %s2090_s29 = smov 0   ;;  %s2092_s30 = smov 0  }
  0x12   :  { %s2094_s0 = smov 0   ;;  %s2096_s19 = smov 0  }
  0x13 LB: > { %2476 = sst [smem:[#allocation15_spill]] %s1956_s27  ;;  %s1566_s1 = sadd.s32 4294967295, %s1976_s19   ;;  %s1976_s19 = sphi %s2096_s19, %s35_s19   ;;  %s1972_s0 = sphi %s2094_s0, %s2500_s0   ;;  %s1968_s30 = sphi %s2092_s30, %s2499_s30   ;;  %s1964_s29 = sphi %s2090_s29, %s2503_s29   ;;  %s1960_s28 = sphi %s2088_s28, %s2502_s28   ;;  %s1956_s27 = sphi %s2086_s27, %s2501_s27  }
  0x14   : > { %2477 = sst [smem:[#allocation16_spill]] %s1972_s0  ;;  %p1568_p0 = scmp.ge.s32.totalorder %s1976_s19, 1 }
  0x15   : > { %p2118_p1 = scmp.eq.s32.totalorder %s1566_s1, 0  ;;  %p479_p2 = scmp.lt.s32.totalorder %s1976_s19, 3 }
  0x16   : > { %s2479_s12 = sld [smem:[#allocation24_spill]]  ;;  %s1978_s24 = smov [#allocation9]  }
  0x17   : > { %p2126_p3 = pnand %p1568_p0, %p479_p2  ;;  %s522_s25 = sshll.u32 %s1978_s24, 4  ;;  %s523_s25 = int_to_ptr.vmem [resolvable:$true] %s522_s25 }
  0x18   : > { %p1570_p6 = scmp.ge.s32.totalorder %s1976_s19, 2  ;;  %s1979_s26 = smov 64  }
  0x19   : > { %p1693_p4 = pneg %p2126_p3  ;;  %s1980_s21 = smov 4  }
  0x1a   : > { %s1567_s22 = sadd.s32 4294967294, %s1976_s19   ;;  %s91_s17 = sadd.s32 1, %s1964_s29 }
  0x1b   : > { %p1694_p5 = pnand %p1693_p4, %p2118_p1  ;;  %p98_p8 = scmp.ne.s32.totalorder %s1964_s29, %s1960_s28 }
  0x1c   : > { %s520_s2 = sshll.u32 %s2479_s12, 4  ;;  %s54_s12 = sadd.s32 1, %s1972_s0  ;;  %s521_s2 = int_to_ptr.hbm [resolvable:$true] %s520_s2 }
  0x1d   : > { %1696 = dma.hbm_to_vmem [thread:$0]  (!%p1694_p5), %s521_s2, 256, %s523_s25, [#allocation10], %s1979_s26, %s1979_s26, %s1980_s21  }
  0x1e   : > { %p56_p7 = scmp.ge.s32.totalorder %s54_s12, 2  ;;  %p99_p9 = scmp.eq.s32.totalorder %s1976_s19, 0 }
  0x1f   : > { %p104_p10 = scmp.ne.s32.totalorder %s1960_s28, %s1956_s27  ;;  %p466_p13 = scmp.eq.s32.totalorder %s1566_s1, 1 }
  0x20   : > { %s2505_s12 = smov (%p56_p7, %s54_s12), 0  ;;  %p2145_p11 = por %p99_p9, %p98_p8 }
  0x21   : > { %2481 = sst [smem:[#allocation17_spill]] %s2505_s12  ;;  %p2151_p12 = por %p2118_p1, %p104_p10 }
  0x22   : > { %s86_s25 = ssub.s32 %s1972_s0, %s2505_s12  ;;  %p472_p2 = scmp.eq.s32.totalorder %s1567_s22, 1 }
  0x23   : > { %p89_p0 = scmp.eq.s32.totalorder %s86_s25, 0  ;;  %p2157_p4 = por %p466_p13, %p98_p8 }
  0x24   : > { %p1706_p5 = scmp.lt.s32.totalorder %s1976_s19, 2  ;;  %p2165_p7 = por %p472_p2, %p104_p10 }
  0x25   : > { %s2163_s21 = scalar_select %p89_p0, %s1964_s29, %s91_s17  }
  0x26   : > { %s561_s18 = sand.u32 1, %s1964_s29   ;;  %s1572_s15 = sshll.u32 %s1972_s0, 2 }
  0x27   : > { %2485 = sst [smem:[#allocation18_spill]] %s2163_s21  ;;  %s1571_s16 = sshll.u32 %s561_s18, 2 }
  0x28   : > { %s2487_s1 = sld [smem:[#allocation20_spill]]  ;;  %s565_s25 = scalar_lea.vmem [#allocation6], %s1571_s16 }
  0x29   : > { %s574_s22 = sshll.u32 %s565_s25, 4  ;;  %p1698_p8 = pnand %p1706_p5, %p2145_p11  ;;  %s575_s22 = int_to_ptr.vmem [resolvable:$true] %s574_s22 }
  0x2a   : > { %s562_s17 = scalar_lea.sflag [#allocation7], %s561_s18  ;;  %s2179_s21 = sand.u32 (!%p2126_p3), 1, %s1960_s28  }
  0x2b   : > { %s1574_s12 = sshll.u32 (!%p2126_p3), %s2179_s21, 2  ;;  %s586_s13 = scalar_lea.sflag (!%p2126_p3), [#allocation7], %s2179_s21 }
  0x2c   : > { %583 = sbr.rel (%p2126_p3) target bundleno = 2022 (0x7e6), region = 92 }
  0x2e   : > { %s570_s11 = scalar_lea.hbm %s2487_s1, %s1572_s15  ;;  %s589_s15 = scalar_lea.vmem (!%p2126_p3), [#allocation6], %s1574_s12 }
  0x2f   : > { %s572_s10 = sshll.u32 %s570_s11, 4  ;;  %s573_s10 = int_to_ptr.hbm [resolvable:$true] %s572_s10 }
  0x30   : > { %1700 = dma.hbm_to_vmem [thread:$0]  (!%p1698_p8), %s573_s10, 64, %s575_s22, %s562_s17  }
  0x31   : > { %1943 = dma.done.wait (%p2151_p12), %s586_s13, 64  }
  0x32   : > { %1945 = vsyncadd (%p2151_p12), %s586_s13, 4294967232 }
  0x33   : > { %1947 = dma.done.wait (%p2118_p1), [#allocation10], 256  }
  0x34   : > { %1949 = vsyncadd (%p2118_p1), [#allocation10], 4294967040  ;;  %p655_p3 = scmp.lt.s32.totalorder %s1968_s30, 1  ;;  %s2488_s23 = sld [smem:[#allocation19_spill]]  ;;  %v1670_v1 = vld [vmem:[%s2445_s4 + $0x8] sm:$0xff]  ;;  %v1669_v3 = vld [vmem:[%s2445_s4] sm:$0xff] }
  0x35   : > { %s2489_s22 = sld [smem:[#allocation21_spill]]  ;;  %770 = vmatpush.bf16.msra.mxu2 %v1670_v1  ;;  %vm689_vm0 = vcmask 261120   ;;  %v739_v6 = vld [vmem:[%s589_s15] sm:$0xf]  ;;  %v1672_v7 = vld [vmem:[%s2447_s6 + $0x8] sm:$0xff]  ;;  %v1671_v8 = vld [vmem:[%s2447_s6] sm:$0xff] }
  0x36   : > { %s656_s10 = scalar_select %p655_p3, %s1968_s30, 1  ;;  %v1788_v9 = vld [vmem:[%s2444_s3] ss:$0 sm:$0xff]  ;;  %vm720_vm1 = vcmask 60416   ;;  %vm734_vm2 = vcmask 64512   ;;  %vm725_vm3 = vcmask 7168  }
  0x37   : > { %v1789_v13 = vld [vmem:[%s2446_s5] ss:$0 sm:$0xff]  ;;  %s1981_s1 = smov 112   ;;  %s1982_s25 = smov 104   ;;  %v1984_v50 = vmov -inf   ;;  %vm1059_vm4 = vcmask 1043456  }
  0x38   : > { %s1577_s11 = sshll.u32 %s656_s10, 3  ;;  %s1983_s2 = smov 120   ;;  %v1790_v48 = vld [vmem:[%s2448_s7] ss:$0 sm:$0xff]  ;;  %726 = vst.msk [vmem:[#allocation3] sm:$0xff] %vm725_vm3, %v1984_v50  ;;  %v1985_v53 = vmov 0.0  }
  0x39   : > { %771 = vmatpush.bf16.msra.mxu2 %v1669_v3  ;;  %727 = vst.msk [vmem:[#allocation3 + $0x8] sm:$0xff] %vm725_vm3, %v1984_v50  ;;  %s1987_s20 = smov 16   ;;  %s1988_s13 = smov 8   ;;  %vm1197_vm5 = vcmask 130048   ;;  %vm1199_vm6 = vcmask 195584  }
  0x3a   : > { %s661_s24 = scalar_lea.vmem %s2488_s23, %s1577_s11  ;;  %728 = vst.msk [vmem:[#allocation3 + $0x10] sm:$0xff] %vm725_vm3, %v1984_v50  ;;  %s1989_s10 = smov 24  }
  0x3b   : > { %v1668_v0 = vld [vmem:[%s2489_s22 + $0x8] sm:$0xff]  ;;  %v1667_v2 = vld [vmem:[%s2489_s22] sm:$0xff]  ;;  %729 = vst.msk [vmem:[#allocation3 + $0x18] sm:$0xff] %vm725_vm3, %v1984_v50  ;;  %s2491_s11 = sld [smem:[#allocation23_spill]]  ;;  %s1576_s23 = sshll.u32 %s2179_s21, 3 }
  0x3c   : > { %699 = vmatpush.bf16.msra.mxu0 %v1668_v0  ;;  %v2208_v4 = vld [vmem:[%s661_s24] sm:$0xff]  ;;  %1595 = vmatmul.msk.bf16.vlgmr.msra.gmra.mxu2 %vm689_vm0, %v739_v6  ;;  %731 = vst.msk [vmem:[#allocation4 + $0x8] sm:$0xff] %vm725_vm3, %v1985_v53  ;;  %s2493_s18 = sld [smem:[#allocation26_spill]]  ;;  %s1664_s15 = sshll.u32 %s1968_s30, 3 }
  0x3d   : > { %v668_v5 = vpack.c.bf16 %v2208_v4, %v2208_v4  ;;  %803 = vmatpush.bf16.msrb.mxu2 %v1672_v7  ;;  %730 = vst.msk [vmem:[#allocation4] sm:$0xff] %vm725_vm3, %v1985_v53  ;;  %s2495_s12 = sld [smem:[#allocation29_spill]]  ;;  %s654_s30 = scalar_lea.vmem [#allocation11], %s1576_s23 }
  0x3e   : > { %732 = vst.msk [vmem:[#allocation4 + $0x10] sm:$0xff] %vm725_vm3, %v1985_v53  ;;  %s1455_s0 = sshll.u32 %s654_s30, 4  ;;  %s1456_s0 = int_to_ptr.vmem [resolvable:$true] %s1455_s0 }
  0x3f   : > { %733 = vst.msk [vmem:[#allocation4 + $0x18] sm:$0xff] %vm725_vm3, %v1985_v53  ;;  %v2270_v55 = vld [vmem:[#allocation3] sm:$0xff] }
  0x40   : > { %700 = vmatpush.bf16.msra.mxu0 %v1667_v2  ;;  %735 = vst.msk [vmem:[#allocation5] sm:$0xff] %vm734_vm2, %v1985_v53 }
  0x41   : > { %804 = vmatpush.bf16.msrb.mxu2 %v1671_v8  ;;  %736 = vst.msk [vmem:[#allocation5 + $0x8] sm:$0xff] %vm734_vm2, %v1985_v53  ;;  %v2286_v8 = vld [vmem:[#allocation3 + $0x8] sm:$0xff] }
  0x42   : > { %737 = vst.msk [vmem:[#allocation5 + $0x10] sm:$0xff] %vm734_vm2, %v1985_v53  ;;  %v2284_v7 = vld [vmem:[#allocation3 + $0x18] sm:$0xff] }
  0x43   : > { %1586 = vmatmul.msk.bf16.vlgmr.msra.gmra.mxu0 %vm689_vm0, %v668_v5  ;;  %738 = vst.msk [vmem:[#allocation5 + $0x18] sm:$0xff] %vm734_vm2, %v1985_v53  ;;  %s1910_s23 = scalar_lea.hbm %s2495_s12, 16 }
  0x4c   : > { %1604 = vmatmul.msk.bf16.vlgmr.msrb.gmra.mxu2 %vm689_vm0, %v739_v6  ;;  %v1986_v6 = vmov 0  }
  0x4d   : > { %1785 = vset.pattern.permute.xlu2 %v1986_v6  ;;  %1787 = vset.pattern.permute.xlu0 %v1986_v6 }
  0x4e   : > { %1786 = vset.pattern.permute.xlu1 %v1986_v6  ;;  %v996_v6 = vld [vmem:[#allocation4 + $0x8] sm:$0xff] }
  0xbf   : > { %v773_v14 = vpop.f32.mrf.mxu2 }
  0xc0   : > { %v702_v10 = vpop.f32.mrf.mxu0  ;;  %v774_v15 = vadd.f32 %v1789_v13, %v773_v14 }
  0xc1   : > { %v703_v11 = vadd.f32 %v1788_v9, %v702_v10 }
  0xc2   : > { %v820_v18 = vpack.c.bf16 %v774_v15, %v774_v15 }
  0xc3   : > { %v716_v12 = vpack.c.bf16 %v703_v11, %v703_v11  ;;  %v1780_v17 = vpack.i.bf16 %v774_v15, %v703_v11  ;;  %v921_v15 = vld [vmem:[#allocation3 + $0x10] sm:$0xff] }
  0xc4   : > { %v847_v19 = vsel %vm734_vm2, %v820_v18, 0 }
  0xc5   : > { %721 = vst.msk [vmem:[#allocation2] sm:$0xf] %vm720_vm1, %v716_v12  ;;  %1781 = vrot.lane.b32.xlu1 %v1780_v17, %s1981_s1  ;;  %1771 = vrot.lane.b32.xlu0 %v1780_v17, %s1982_s25 }
  0xc6   : > { %856 = vmatpush.bf16.xpose.msra.mxu3 %v847_v19 }
  0xc7   : > { %v775_v20 = vpop.f32.mrf.mxu2 }
  0xc8   : > { %v704_v16 = vpop.f32.mrf.mxu0 }
  0xcc   : > { %v838_v21 = vld [vmem:[#allocation2] sm:$0xf] }
  0xcd   : > { %1776 = vrot.lane.b32.xlu0 %v1780_v17, %s1983_s2  ;;  %1605 = vmatmul.msk.bf16.vlgmr.msra.gmra.mxu3 %vm734_vm2, %v838_v21 }
  0xcf   : > { %v806_v28 = vpop.f32.mrf.mxu2 }
  0xd0   : > { %v2249_v49 = vadd.f32 %v1790_v48, %v806_v28 }
  0xd2   : > { %v834_v51 = vpack.c.bf16 %v2249_v49, %v2249_v49 }
  0xd4   : > { %v1061_v52 = vsel %vm1059_vm4, %v834_v51, 0 }
  0xd5   : > { %1070 = vmatpush.bf16.msrb.mxu3 %v1061_v52 }
  0xd7   : > { %v808_v38 = vpop.f32.mrf.mxu2 }
 0x137   : > { %v1782_v22 = vpop.permute.xlu1 %1781  ;;  %v1772_v23 = vpop.permute.xlu0 %1771 }
 0x138   : > { %v1784_v24 = vunpack.i.h.bf16 %v1782_v22  ;;  %v1783_v25 = vunpack.i.l.bf16 %v1782_v22  ;;  %v1774_v26 = vunpack.i.h.bf16 %v1772_v23  ;;  %v1773_v27 = vunpack.i.l.bf16 %v1772_v23 }
 0x13a   : > { %v718_v29 = vpack.c.bf16 %v1783_v25, %v1783_v25  ;;  %v823_v30 = vpack.c.bf16 %v1774_v26, %v1774_v26  ;;  %v719_v31 = vpack.c.bf16 %v1773_v27, %v1773_v27  ;;  %v822_v32 = vpack.c.bf16 %v1784_v24, %v1784_v24 }
 0x13c   : > { %723 = vst.msk [vmem:[#allocation2 + $0x8] sm:$0xf] %vm720_vm1, %v718_v29  ;;  %v885_v33 = vsel %vm734_vm2, %v822_v32, 0  ;;  %v904_v34 = vsel %vm734_vm2, %v823_v30, 0 }
 0x13d   : > { %724 = vst.msk [vmem:[#allocation2 + $0xc] sm:$0xf] %vm720_vm1, %v719_v31  ;;  %894 = vmatpush.bf16.xpose.msra.mxu1 %v885_v33  ;;  %913 = vmatpush.bf16.xpose.msra.mxu2 %v904_v34 }
 0x13f   : > { %v1777_v35 = vpop.permute.xlu0 %1776 }
 0x140   : > { %v1779_v36 = vunpack.i.h.bf16 %v1777_v35  ;;  %v1778_v37 = vunpack.i.l.bf16 %v1777_v35 }
 0x142   : > { %v821_v39 = vpack.c.bf16 %v1779_v36, %v1779_v36  ;;  %v717_v40 = vpack.c.bf16 %v1778_v37, %v1778_v37 }
 0x143   : > { %v840_v41 = vld [vmem:[#allocation2 + $0x8] sm:$0xf] }
 0x144   : > { %722 = vst.msk [vmem:[#allocation2 + $0x4] sm:$0xf] %vm720_vm1, %v717_v40  ;;  %1607 = vmatmul.msk.bf16.vlgmr.msra.gmra.mxu1 %vm734_vm2, %v840_v41  ;;  %v841_v42 = vld [vmem:[#allocation2 + $0xc] sm:$0xf]  ;;  %v866_v43 = vsel %vm734_vm2, %v821_v39, 0 }
 0x145   : > { %1608 = vmatmul.msk.bf16.vlgmr.msra.gmra.mxu2 %vm734_vm2, %v841_v42  ;;  %875 = vmatpush.bf16.xpose.msrb.mxu0 %v866_v43 }
 0x14b   : > { %v839_v44 = vld [vmem:[#allocation2 + $0x4] sm:$0xf] }
 0x14c   : > { %1606 = vmatmul.msk.bf16.vlgmr.msrb.gmra.mxu0 %vm734_vm2, %v839_v44 }
 0x150   : > { %v2242_v45 = vpop.f32.mrf.mxu3 }
 0x151   : > { %v923_v46 = vsel %vm734_vm2, %v2242_v45, -inf }
 0x152   : > { %924 = vmax.xlane.f32.xlu0 %v923_v46 }
 0x158   : > { %v860_v47 = vpop.f32.mrf.mxu3 }
 0x166   : > { %828 = vrot.lane.b32.xlu0 %v2249_v49, %s1981_s1 }
 0x1c1   : > { %v2268_v54 = vpop.f32.mrf.mxu1 }
 0x1c2   : > { %v929_v1 = vsel %vm734_vm2, %v2268_v54, -inf }
 0x1c5   : > { %v925_v56 = vpop.xlane.xlu0 %924 }
 0x1c6   : > { %v2273_v57 = vmax.f32 %v2270_v55, %v925_v56 }
 0x1c8   : > { %1141 = vst.msk [vmem:[#allocation3] sm:$0xff] %vm725_vm3, %v2273_v57  ;;  %v915_v58 = vpop.f32.mrf.mxu2 }
 0x1c9   : > { %v877_v59 = vpop.f32.mrf.mxu0  ;;  %v898_v60 = vpop.f32.mrf.mxu1  ;;  %v932_v61 = vsel %vm734_vm2, %v915_v58, -inf }
 0x1ca   : > { %933 = vmax.xlane.f32.xlu1 %v932_v61  ;;  %v926_v62 = vsel %vm734_vm2, %v877_v59, -inf }
 0x1cb   : > { %927 = vmax.xlane.f32.xlu2 %v926_v62 }
 0x1d0   : > { %v917_v63 = vpop.f32.mrf.mxu2 }
 0x1d1   : > { %v879_v0 = vpop.f32.mrf.mxu0 }
 0x1d3   : > { %930 = vmax.xlane.f32.xlu2 %v929_v1 }
 0x1d8   : > { %v829_v2 = vpop.permute.xlu0 %828 }
 0x1d9   : > { %v836_v3 = vpack.c.bf16 %v829_v2, %v829_v2 }
 0x1db   : > { %v1099_v5 = vsel %vm1059_vm4, %v836_v3, 0 }
 0x1dc   : > { %1108 = vmatpush.bf16.msrb.mxu1 %v1099_v5 }
 0x1e3   : > { %831 = vrot.lane.b32.xlu1 %v2249_v49, %s1982_s25  ;;  %s2494_s25 = sld [smem:[#allocation27_spill]] }
 0x23d   : > { %v934_v9 = vpop.xlane.xlu1 %933 }
 0x23e   : > { %v2289_v10 = vmax.f32 %v2284_v7, %v934_v9  ;;  %v928_v11 = vpop.xlane.xlu2 %927 }
 0x23f   : > { %v2292_v12 = vmax.f32 %v2286_v8, %v928_v11 }
 0x240   : > { %v942_v13 = vsub.f32 %v2284_v7, %v2289_v10  ;;  %1144 = vst.msk [vmem:[#allocation3 + $0x18] sm:$0xff] %vm725_vm3, %v2289_v10  ;;  %v939_v7 = vsub.f32 %v2270_v55, %v2273_v57 }
 0x241   : > { %v940_v14 = vsub.f32 %v2286_v8, %v2292_v12  ;;  %1142 = vst.msk [vmem:[#allocation3 + $0x8] sm:$0xff] %vm725_vm3, %v2292_v12  ;;  %958 = vperm.xlu2 %1785, %v2292_v12   ;;  %v998_v8 = vld [vmem:[#allocation4 + $0x18] sm:$0xff] }
 0x242   : > { %v949_v3 = vmul.f32 1.442695, %v942_v13 }
 0x246   : > { %v931_v16 = vpop.xlane.xlu2 %930 }
 0x247   : > { %v937_v17 = vmax.f32 %v921_v15, %v931_v16 }
 0x249   : > { %v941_v18 = vsub.f32 %v921_v15, %v937_v17  ;;  %1143 = vst.msk [vmem:[#allocation3 + $0x10] sm:$0xff] %vm725_vm3, %v937_v17  ;;  %968 = vperm.xlu2 %1785, %v2289_v10  }
 0x251   : > { %963 = vperm.xlu2 %1785, %v937_v17  }
 0x255   : > { %v832_v19 = vpop.permute.xlu1 %831 }
 0x256   : > { %v837_v20 = vpack.c.bf16 %v832_v19, %v832_v19 }
 0x258   : > { %v1118_v21 = vsel %vm1059_vm4, %v837_v20, 0 }
 0x259   : > { %1127 = vmatpush.bf16.msrb.mxu2 %v1118_v21  ;;  %825 = vrot.lane.b32.xlu2 %v2249_v49, %s1983_s2  ;;  %v943_v21 = vmul.f32 1.442695, %v939_v7 }
 0x261   : > { %953 = vperm.xlu2 %1785, %v2273_v57  }
 0x29b   : > { %v959_v22 = vpop.permute.xlu2 %958 }
 0x29c   : > { %v972_v23 = vsub.f32 %v877_v59, %v959_v22  ;;  %v947_v59 = vmul.f32 1.442695, %v941_v18  ;;  %v997_v18 = vld [vmem:[#allocation4 + $0x10] sm:$0xff] }
 0x29e   : > { %v976_v24 = vpack.c.bf16 %v972_v23, %v972_v23 }
 0x2a0   : > { %v980_v25 = vunpack.c.l.bf16 %v976_v24 }
 0x2a2   : > { %v985_v26 = vmul.f32 1.442695, %v980_v25 }
 0x2a3   : > { %v969_v27 = vpop.permute.xlu2 %968 }
 0x2a4   : > { %1798 = vpow2.f32 %v985_v26  ;;  %v974_v28 = vsub.f32 %v915_v58, %v969_v27  ;;  %v1030_v27 = vld [vmem:[#allocation5 + $0x10] sm:$0xff] }
 0x2a6   : > { %v978_v29 = vpack.c.bf16 %v974_v28, %v974_v28 }
 0x2a8   : > { %v982_v30 = vunpack.c.l.bf16 %v978_v29 }
 0x2aa   : > { %v1799_v31 = vpop.eup %1798  ;;  %v989_v32 = vmul.f32 1.442695, %v982_v30 }
 0x2ab   : > { %v992_v33 = vpack.c.bf16 %v1799_v31, %v1799_v31  ;;  %v964_v34 = vpop.permute.xlu2 %963  ;;  %v995_v31 = vld [vmem:[#allocation4] sm:$0xff] }
 0x2ac   : > { %1800 = vpow2.f32 %v989_v32  ;;  %v973_v35 = vsub.f32 %v2268_v54, %v964_v34 }
 0x2ad   : > { %v1004_v36 = vunpack.c.l.bf16 %v992_v33 }
 0x2ae   : > { %v977_v37 = vpack.c.bf16 %v973_v35, %v973_v35 }
 0x2af   : > { %v1010_v38 = vsel %vm734_vm2, %v1004_v36, 0.0 }
 0x2b0   : > { %v981_v39 = vunpack.c.l.bf16 %v977_v37  ;;  %1011 = vadd.xlane.f32.xlu2 %v1010_v38 }
 0x2b2   : > { %v1801_v40 = vpop.eup %1800  ;;  %v987_v41 = vmul.f32 1.442695, %v981_v39  ;;  %v1029_v39 = vld [vmem:[#allocation5 + $0x8] sm:$0xff] }
 0x2b3   : > { %v994_v42 = vpack.c.bf16 %v1801_v40, %v1801_v40  ;;  %v826_v43 = vpop.permute.xlu2 %825  ;;  %v1031_v40 = vld [vmem:[#allocation5 + $0x18] sm:$0xff] }
 0x2b4   : > { %1802 = vpow2.f32 %v987_v41  ;;  %v835_v44 = vpack.c.bf16 %v826_v43, %v826_v43 }
 0x2b5   : > { %1612 = vmatmul.msk.bf16.vlgmr.msrb.gmra.mxu2 %vm734_vm2, %v994_v42  ;;  %v1006_v46 = vunpack.c.l.bf16 %v994_v42 }
 0x2b6   : > { %v1080_v47 = vsel %vm1059_vm4, %v835_v44, 0 }
 0x2b7   : > { %1089 = vmatpush.bf16.msra.mxu0 %v1080_v47  ;;  %v1016_v48 = vsel %vm734_vm2, %v1006_v46, 0.0 }
 0x2b8   : > { %1017 = vadd.xlane.f32.xlu0 %v1016_v48 }
 0x2ba   : > { %v1803_v49 = vpop.eup %1802  ;;  %1610 = vmatmul.msk.bf16.vlgmr.msra.gmra.mxu0 %vm734_vm2, %v992_v33 }
 0x2bb   : > { %v993_v50 = vpack.c.bf16 %v1803_v49, %v1803_v49  ;;  %v954_v51 = vpop.permute.xlu2 %953 }
 0x2bc   : > { %v971_v52 = vsub.f32 %v2242_v45, %v954_v51  ;;  %v945_v45 = vmul.f32 1.442695, %v940_v14 }
 0x2bd   : > { %1611 = vmatmul.msk.bf16.vlgmr.msrb.gmra.mxu1 %vm734_vm2, %v993_v50  ;;  %v1005_v53 = vunpack.c.l.bf16 %v993_v50 }
 0x2be   : > { %v975_v54 = vpack.c.bf16 %v971_v52, %v971_v52 }
 0x2bf   : > { %v1013_v56 = vsel %vm734_vm2, %v1005_v53, 0.0 }
 0x2c0   : > { %v979_v58 = vunpack.c.l.bf16 %v975_v54  ;;  %1014 = vadd.xlane.f32.xlu1 %v1013_v56  ;;  %v1028_v56 = vld [vmem:[#allocation5] sm:$0xff] }
 0x2c2   : > { %v983_v60 = vmul.f32 1.442695, %v979_v58 }
 0x2c4   : > { %1804 = vpow2.f32 %v983_v60 }
 0x2c5   : > { %1806 = vpow2.f32 %v947_v59 }
 0x2c6   : > { %1808 = vpow2.f32 %v945_v45 }
 0x2c7   : > { %1810 = vpow2.f32 %v949_v3  ;;  %v1673_v3 = vld [vmem:[%s2449_s8] sm:$0xff] }
 0x2ca   : > { %v1805_v61 = vpop.eup %1804 }
 0x2cb   : > { %v1807_v62 = vpop.eup %1806  ;;  %v991_v63 = vpack.c.bf16 %v1805_v61, %v1805_v61 }
 0x2cc   : > { %1044 = vperm.xlu0 %1787, %v1807_v62   ;;  %v1809_v2 = vpop.eup %1808  ;;  %v1001_v10 = vmul.f32 %v1807_v62, %v997_v18  ;;  %v1791_v18 = vld [vmem:[%s2450_s9] ss:$0 sm:$0xff] }
 0x2cd   : > { %1609 = vmatmul.msk.bf16.vlgmr.msrb.gmra.mxu3 %vm734_vm2, %v991_v63  ;;  %v1003_v0 = vunpack.c.l.bf16 %v991_v63  ;;  %v1811_v5 = vpop.eup %1810  ;;  %v1000_v9 = vmul.f32 %v1809_v2, %v996_v6 }
 0x2ce   : > { %v1002_v12 = vmul.f32 %v1811_v5, %v998_v8 }
 0x2cf   : > { %v1007_v1 = vsel %vm734_vm2, %v1003_v0, 0.0 }
 0x2d0   : > { %1008 = vadd.xlane.f32.xlu2 %v1007_v1 }
 0x2d9   : > { %1039 = vperm.xlu1 %1786, %v1809_v2   ;;  %v1674_v2 = vld [vmem:[%s2449_s8 + $0x8] sm:$0xff] }
 0x2da   : > { %1231 = vmatpush.bf16.msra.mxu3 %v1674_v2 }
 0x2de   : > { %1232 = vmatpush.bf16.msra.mxu3 %v1673_v3 }
 0x2e8   : > { %1049 = vperm.xlu2 %1785, %v1811_v5  }
 0x323   : > { %v1012_v11 = vpop.xlane.xlu2 %1011 }
 0x324   : > { %v1020_v15 = vadd.f32 %v1012_v11, %v1000_v9 }
 0x326   : > { %1025 = vst.msk [vmem:[#allocation4 + $0x8] sm:$0xff] %vm725_vm3, %v1020_v15 }
 0x32b   : > { %v1018_v14 = vpop.xlane.xlu0 %1017 }
 0x32c   : > { %v1022_v16 = vadd.f32 %v1018_v14, %v1002_v12 }
 0x32d   : > { %v1153_v17 = vld [vmem:[#allocation4 + $0x8] sm:$0xff] }
 0x32e   : > { %1027 = vst.msk [vmem:[#allocation4 + $0x18] sm:$0xff] %vm725_vm3, %v1022_v16  ;;  %1812 = vrcp.f32 %v1153_v17 }
 0x333   : > { %v1015_v13 = vpop.xlane.xlu1 %1014 }
 0x334   : > { %v1813_v19 = vpop.eup %1812  ;;  %v1021_v20 = vadd.f32 %v1015_v13, %v1001_v10 }
 0x335   : > { %1167 = vperm.xlu1 %1786, %v1813_v19   ;;  %v1155_v22 = vld [vmem:[#allocation4 + $0x18] sm:$0xff] }
 0x336   : > { %1026 = vst.msk [vmem:[#allocation4 + $0x10] sm:$0xff] %vm725_vm3, %v1021_v20  ;;  %1814 = vrcp.f32 %v1155_v22 }
 0x337   : > { %v1091_v23 = vpop.f32.mrf.mxu0  ;;  %1816 = vpow2.f32 %v943_v21  ;;  %v1990_v21 = vmov 32.0  }
 0x338   : > { %v1129_v24 = vpop.f32.mrf.mxu2 }
 0x33a   : > { %v1110_v25 = vpop.f32.mrf.mxu1 }
 0x33c   : > { %v1815_v26 = vpop.eup %1814 }
 0x33d   : > { %1177 = vperm.xlu1 %1786, %v1815_v26   ;;  %v1154_v28 = vld [vmem:[#allocation4 + $0x10] sm:$0xff]  ;;  %v1817_v55 = vpop.eup %1816 }
 0x33e   : > { %v1045_v29 = vpop.permute.xlu0 %1044  ;;  %1818 = vrcp.f32 %v1154_v28  ;;  %v999_v35 = vmul.f32 %v1817_v55, %v995_v31  ;;  %v1675_v31 = vld [vmem:[#allocation9] sm:$0xff] }
 0x33f   : > { %v1054_v57 = vmul.f32 %v1045_v29, %v1030_v27  ;;  %v1093_v30 = vpop.f32.mrf.mxu0 }
 0x340   : > { %v1131_v32 = vpop.f32.mrf.mxu2  ;;  %v1676_v30 = vld [vmem:[#allocation9 + $0x8] sm:$0xff] }
 0x341   : > { %v1135_v33 = vadd.f32 %v1110_v25, %v1054_v57  ;;  %1309 = vmatpush.bf16.msrb.mxu0 %v1676_v30  ;;  %v1684_v32 = vld [vmem:[%s2455_s14 + $0x38] sm:$0xff] }
 0x342   : > { %v1112_v34 = vpop.f32.mrf.mxu1  ;;  %1394 = vmatpush.bf16.msra.mxu1 %v1684_v32 }
 0x343   : > { %1139 = vst.msk [vmem:[#allocation5 + $0x10] sm:$0xff] %vm734_vm2, %v1135_v33  ;;  %v1009_v36 = vpop.xlane.xlu2 %1008 }
 0x344   : > { %v1819_v37 = vpop.eup %1818  ;;  %v1019_v38 = vadd.f32 %v1009_v36, %v999_v35  ;;  %v1683_v35 = vld [vmem:[%s2455_s14 + $0x30] sm:$0xff] }
 0x345   : > { %1172 = vperm.xlu2 %1785, %v1819_v37   ;;  %1310 = vmatpush.bf16.msrb.mxu0 %v1675_v31 }
 0x346   : > { %1024 = vst.msk [vmem:[#allocation4] sm:$0xff] %vm725_vm3, %v1019_v38  ;;  %1395 = vmatpush.bf16.msra.mxu1 %v1683_v35 }
 0x34a   : > { %v1150_v53 = vld [vmem:[#allocation5 + $0x10] sm:$0xff] }
 0x34b   : > { %v1040_v41 = vpop.permute.xlu1 %1039  ;;  %v1050_v42 = vpop.permute.xlu2 %1049 }
 0x34c   : > { %v1053_v43 = vmul.f32 %v1040_v41, %v1029_v39  ;;  %v1055_v44 = vmul.f32 %v1050_v42, %v1031_v40 }
 0x34d   : > { %1034 = vperm.xlu2 %1785, %v1817_v55   ;;  %v1152_v46 = vld [vmem:[#allocation4] sm:$0xff] }
 0x34e   : > { %v1134_v47 = vadd.f32 %v1091_v23, %v1053_v43  ;;  %v1136_v48 = vadd.f32 %v1129_v24, %v1055_v44  ;;  %1820 = vrcp.f32 %v1152_v46  ;;  %v1793_v46 = vld [vmem:[%s2491_s11] ss:$0 sm:$0xff]  ;;  %s2492_s11 = sld [smem:[#allocation25_spill]] }
 0x34f   : > { %1822 = vrcp.f32 %v1990_v21 }
 0x350   : > { %1138 = vst.msk [vmem:[#allocation5 + $0x8] sm:$0xff] %vm734_vm2, %v1134_v47  ;;  %v1072_v49 = vpop.f32.mrf.mxu3 }
 0x351   : > { %1140 = vst.msk [vmem:[#allocation5 + $0x18] sm:$0xff] %vm734_vm2, %v1136_v48 }
 0x354   : > { %v1821_v50 = vpop.eup %1820 }
 0x355   : > { %1162 = vperm.xlu1 %1786, %v1821_v50   ;;  %v1823_v22 = vpop.eup %1822 }
 0x356   : > { %v1246_v23 = vmul.f32 32.0, %v1823_v22  ;;  %vm1250_vm7 = vweird.f32 %v1823_v22 }
 0x357   : > { %v1149_v58 = vld [vmem:[#allocation5 + $0x8] sm:$0xff] }
 0x358   : > { %v1074_v51 = vpop.f32.mrf.mxu3  ;;  %v1151_v0 = vld [vmem:[#allocation5 + $0x18] sm:$0xff]  ;;  %v1247_v24 = vsub.f32 1.0, %v1246_v23 }
 0x359   : > { %v1682_v51 = vld [vmem:[%s2455_s14 + $0x28] sm:$0xff] }
 0x35a   : > { %v1248_v25 = vmul.f32 %v1823_v22, %v1247_v24  ;;  %1396 = vmatpush.bf16.msra.mxu1 %v1682_v51 }
 0x35c   : > { %v1249_v26 = vadd.f32 %v1823_v22, %v1248_v25 }
 0x35e   : > { %v2349_v27 = vsel %vm1250_vm7, %v1823_v22, %v1249_v26 }
 0x39f   : > { %v1173_v52 = vpop.permute.xlu2 %1172 }
 0x3a0   : > { %v1182_v54 = vmul.f32 %v1173_v52, %v1150_v53  ;;  %v1681_v52 = vld [vmem:[%s2455_s14 + $0x20] sm:$0xff]  ;;  %v1680_v53 = vld [vmem:[%s2455_s14 + $0x18] sm:$0xff] }
 0x3a1   : > { %1397 = vmatpush.bf16.msra.mxu1 %v1681_v52 }
 0x3a2   : > { %1189 = vrot.lane.b32.xlu2 %v1182_v54, %s1987_s20  ;;  %s2490_s20 = sld [smem:[#allocation22_spill]]  ;;  %v1679_v54 = vld [vmem:[%s2455_s14 + $0x10] sm:$0xff] }
 0x3a5   : > { %1398 = vmatpush.bf16.msra.mxu1 %v1680_v53 }
 0x3a7   : > { %v1168_v59 = vpop.permute.xlu1 %1167  ;;  %v1035_v60 = vpop.permute.xlu2 %1034 }
 0x3a8   : > { %v1181_v61 = vmul.f32 %v1168_v59, %v1149_v58  ;;  %v1052_v62 = vmul.f32 %v1035_v60, %v1028_v56  ;;  %v1792_v43 = vld [vmem:[%s2490_s20] ss:$0 sm:$0xff]  ;;  %v1678_v56 = vld [vmem:[%s2455_s14 + $0x8] sm:$0xff]  ;;  %s1453_s20 = scalar_lea.hbm %s2495_s12, %s1664_s15 }
 0x3a9   : > { %1399 = vmatpush.bf16.msra.mxu1 %v1679_v54  ;;  %v1677_v58 = vld [vmem:[%s2455_s14] sm:$0xff]  ;;  %s1457_s16 = sshll.u32 %s1453_s20, 4  ;;  %s1458_s16 = int_to_ptr.hbm [resolvable:$true] %s1457_s16 }
 0x3aa   : > { %v1133_v63 = vadd.f32 %v1072_v49, %v1052_v62  ;;  %1185 = vrot.lane.b32.xlu0 %v1181_v61, %s1988_s13  ;;  %v1794_v59 = vld [vmem:[%s2492_s11] ss:$0 sm:$0xff]  ;;  %s2496_s11 = sld [smem:[#allocation28_spill]]  ;;  %s1904_s24 = sshra.s32 %s1458_s16, 4  ;;  %s1905_s24 = int_to_ptr.hbm [resolvable:$true] %s1904_s24 }
 0x3ab   : > { %s1906_s15 = scalar_lea.hbm %s1905_s24, 8  ;;  %p1911_p11 = scmp.lt.s32.totalorder %s1905_s24, %s2495_s12 }
 0x3ac   : > { %1137 = vst.msk [vmem:[#allocation5] sm:$0xff] %vm734_vm2, %v1133_v63  ;;  %p1907_p1 = scmp.ne.s32.totalorder %s1905_s24, %s1906_s15  ;;  %p1912_p12 = scmp.lt.s32.totalorder %s1910_s23, %s1906_s15 }
 0x3ad   : > { %1400 = vmatpush.bf16.msra.mxu1 %v1678_v56 }
 0x3ae   : > { %p1908_p9 = pnand %p1907_p1, %p2157_p4  ;;  %p1913_p13 = por %p1912_p12, %p1911_p11 }
 0x3af   : > { %v1178_v45 = vpop.permute.xlu1 %1177 }
 0x3b0   : > { %v1183_v1 = vmul.f32 %v1178_v45, %v1151_v0  ;;  %p1909_p10 = pneg %p1908_p9 }
 0x3b1   : > { %1401 = vmatpush.bf16.msra.mxu1 %v1677_v58 }
 0x3b2   : > { %1193 = vrot.lane.b32.xlu1 %v1183_v1, %s1989_s10  ;;  %p1914_p0 = pnand %p1913_p13, %p1909_p10 }
 0x3b3   : > { %v1148_v6 = vld [vmem:[#allocation5] sm:$0xff] }
 0x3c7   : > { %v1163_v5 = vpop.permute.xlu1 %1162 }
 0x3c8   : > { %v1180_v11 = vmul.f32 %v1163_v5, %v1148_v6 }
 0x3fc   : > { %v1190_v8 = vpop.permute.xlu2 %1189 }
 0x41c   : > { %v1186_v9 = vpop.permute.xlu0 %1185 }
 0x41d   : > { %v1196_v15 = vsel %vm734_vm2, %v1180_v11, %v1186_v9 }
 0x41e   : > { %v1198_v14 = vsel %vm1197_vm5, %v1196_v15, %v1190_v8  ;;  %v1795_v15 = vld [vmem:[%s2493_s18] ss:$0 sm:$0xff]  ;;  %s1442_s18 = scalar_lea.sflag [#allocation8], %s2179_s21 }
 0x424   : > { %v1194_v12 = vpop.permute.xlu1 %1193 }
 0x425   : > { %v1200_v16 = vsel %vm1199_vm6, %v1198_v14, %v1194_v12 }
 0x426   : > { %v1201_v17 = vpack.c.bf16 %v1200_v16, %v1200_v16 }
 0x428   : > { %1621 = vmatmul.msk.bf16.vlgmr.msra.gmra.mxu3 %vm689_vm0, %v1201_v17 }
 0x4ab   : > { %v1234_v7 = vpop.f32.mrf.mxu3 }
 0x4ac   : > { %v1235_v10 = vadd.f32 %v1791_v18, %v1234_v7 }
 0x4ae   : > { %v1239_v13 = vadd.f32 %v1235_v10, %v2208_v4 }
 0x4b0   : > { %v1242_v19 = vsel %vm689_vm0, %v1239_v13, 0.0 }
 0x4b1   : > { %1243 = vadd.xlane.f32.xlu0 %v1242_v19 }
 0x4b3   : > { %v1236_v20 = vpop.f32.mrf.mxu3 }
 0x524   : > { %v1244_v28 = vpop.xlane.xlu0 %1243 }
 0x525   : > { %v1252_v29 = vmul.f32 %v2349_v27, %v1244_v28 }
 0x527   : > { %v1253_v55 = vsub.f32 %v1239_v13, %v1252_v29 }
 0x529   : > { %v1254_v57 = vmul.f32 %v1253_v55, %v1253_v55 }
 0x52b   : > { %v1255_v4 = vsel %vm689_vm0, %v1254_v57, 0.0 }
 0x52c   : > { %1256 = vadd.xlane.f32.xlu2 %v1255_v4  ;;  %v1797_v4 = vld [vmem:[%s2496_s11] ss:$0 sm:$0xff] }
 0x59f   : > { %v1257_v33 = vpop.xlane.xlu2 %1256 }
 0x5a0   : > { %v1258_v34 = vmul.f32 %v1257_v33, %v2349_v27 }
 0x5a2   : > { %v1259_v36 = vadd.f32 1e-05, %v1258_v34 }
 0x5a4   : > { %1824 = vrsqrt.f32 %v1259_v36  ;;  %vm1266_vm9 = vweird.f32 %v1259_v36 }
 0x5aa   : > { %v1825_v37 = vpop.eup %1824 }
 0x5ab   : > { %v1261_v38 = vmul.f32 %v1825_v37, %v1259_v36  ;;  %vm1267_vm8 = vweird.f32 %v1825_v37 }
 0x5ac   : > { %vm1268_vm10 = vmor %vm1266_vm9, %vm1267_vm8 }
 0x5ad   : > { %v1262_v39 = vmul.f32 %v1825_v37, %v1261_v38 }
 0x5af   : > { %v1263_v40 = vmul.f32 0.5, %v1262_v39 }
 0x5b1   : > { %v1264_v41 = vsub.f32 1.5, %v1263_v40 }
 0x5b3   : > { %v1265_v42 = vmul.f32 %v1825_v37, %v1264_v41 }
 0x5b5   : > { %v1269_v44 = vsel %vm1268_vm10, %v1825_v37, %v1265_v42 }
 0x5b6   : > { %v1270_v47 = vmul.f32 %v1269_v44, %v1253_v55  ;;  %v1796_v55 = vld [vmem:[%s2494_s25] ss:$0 sm:$0xff] }
 0x5b8   : > { %v1274_v48 = vmul.f32 %v1792_v43, %v1270_v47 }
 0x5ba   : > { %v1278_v49 = vadd.f32 %v1793_v46, %v1274_v48 }
 0x5bc   : > { %v1279_v50 = vpack.c.bf16 %v1278_v49, %v1278_v49 }
 0x5be   : > { %1630 = vmatmul.msk.bf16.vlgmr.msrb.gmra.mxu0 %vm689_vm0, %v1279_v50 }
 0x63b   : > { %v1312_v60 = vpop.f32.mrf.mxu0 }
 0x63c   : > { %v1313_v61 = vadd.f32 %v1794_v59, %v1312_v60 }
 0x63e   : > { %v1317_v62 = vmul.f32 0.044715, %v1313_v61  ;;  %v1316_v5 = vmul.f32 0.5, %v1313_v61 }
 0x640   : > { %v1318_v63 = vmul.f32 %v1317_v62, %v1313_v61 }
 0x642   : > { %v1319_v0 = vmul.f32 %v1318_v63, %v1313_v61 }
 0x643   : > { %v1314_v45 = vpop.f32.mrf.mxu0 }
 0x644   : > { %v1320_v1 = vadd.f32 %v1319_v0, %v1313_v61 }
 0x646   : > { %v1321_v2 = vmul.f32 0.7978846, %v1320_v1 }
 0x648   : > { %1826 = vtanh.f32 %v1321_v2 }
 0x64e   : > { %v1827_v3 = vpop.eup %1826 }
 0x64f   : > { %v1323_v6 = vadd.f32 1.0, %v1827_v3 }
 0x651   : > { %v1324_v9 = vmul.f32 %v1323_v6, %v1316_v5 }
 0x653   : > { %v1325_v11 = vpack.c.bf16 %v1324_v9, %v1324_v9 }
 0x655   : > { %1402 = vmatmul.bf16.vlgmr.msra.gmra.mxu1 %v1325_v11 }
 0x6d2   : > { %v1403_v8 = vpop.f32.mrf.mxu1 }
 0x6d3   : > { %v1404_v12 = vadd.f32 %v1795_v15, %v1403_v8 }
 0x6d5   : > { %v1407_v14 = vadd.f32 %v1404_v12, %v1278_v49 }
 0x6d7   : > { %v1410_v16 = vsel %vm689_vm0, %v1407_v14, 0.0 }
 0x6d8   : > { %1411 = vadd.xlane.f32.xlu1 %v1410_v16 }
 0x6da   : > { %v1405_v17 = vpop.f32.mrf.mxu1 }
 0x74b   : > { %v1412_v18 = vpop.xlane.xlu1 %1411 }
 0x74c   : > { %v1413_v7 = vmul.f32 %v1412_v18, %v2349_v27 }
 0x74e   : > { %v1414_v10 = vsub.f32 %v1407_v14, %v1413_v7 }
 0x750   : > { %v1415_v13 = vmul.f32 %v1414_v10, %v1414_v10 }
 0x752   : > { %v1416_v19 = vsel %vm689_vm0, %v1415_v13, 0.0 }
 0x753   : > { %1417 = vadd.xlane.f32.xlu0 %v1416_v19 }
 0x7c6   : > { %v1418_v20 = vpop.xlane.xlu0 %1417 }
 0x7c7   : > { %v1419_v21 = vmul.f32 %v1418_v20, %v2349_v27 }
 0x7c9   : > { %v1420_v22 = vadd.f32 1e-05, %v1419_v21 }
 0x7cb   : > { %1828 = vrsqrt.f32 %v1420_v22  ;;  %vm1427_vm12 = vweird.f32 %v1420_v22 }
 0x7d1   : > { %v1829_v23 = vpop.eup %1828 }
 0x7d2   : > { %v1422_v24 = vmul.f32 %v1829_v23, %v1420_v22  ;;  %vm1428_vm11 = vweird.f32 %v1829_v23 }
 0x7d3   : > { %vm1429_vm13 = vmor %vm1427_vm12, %vm1428_vm11 }
 0x7d4   : > { %v1423_v25 = vmul.f32 %v1829_v23, %v1422_v24 }
 0x7d6   : > { %v1424_v26 = vmul.f32 0.5, %v1423_v25 }
 0x7d8   : > { %v1425_v28 = vsub.f32 1.5, %v1424_v26 }
 0x7da   : > { %v1426_v29 = vmul.f32 %v1829_v23, %v1425_v28 }
 0x7dc   : > { %v1430_v27 = vsel %vm1429_vm13, %v1829_v23, %v1426_v29 }
 0x7dd   : > { %v1431_v57 = vmul.f32 %v1430_v27, %v1414_v10 }
 0x7df   : > { %v1435_v30 = vmul.f32 %v1796_v55, %v1431_v57 }
 0x7e1   : > { %v1439_v31 = vadd.f32 %v1797_v4, %v1435_v30 }
 0x7e3   : > { %1440 = vst.msk [vmem:[%s654_s30] sm:$0xff] %vm689_vm0, %v1439_v31 }
 0x7e4   : > { %1917 = shalt.err (!%p1914_p0)
}
 0x7e5   : > { %1691 = dma.vmem_to_hbm [thread:$0]  (%p2157_p4), %s1456_s0, 128, %s1458_s16, %s1442_s18  }
 0x7e6 PF: > { %s2497_s21 = sld [smem:[#allocation15_spill]]  ;;  %p1702_p2 = pnand %p1570_p6, %p2165_p7 }
 0x7e8   : > { %p1703_p5 = pneg %p1702_p2 }
 0x7ec   : > { %s1469_s20 = sand.u32 1, %s2497_s21  }
 0x7ed   : > { %s1470_s13 = scalar_lea.sflag [#allocation8], %s1469_s20 }
 0x7ee   : > { %1951 = dma.done.wait (%p1703_p5), %s1470_s13, 128  }
 0x7ef   : > { %1953 = vsyncadd (%p1703_p5), %s1470_s13, 4294967168  ;;  %s35_s19 = sadd.s32 1, %s1976_s19   ;;  %s2498_s10 = sld [smem:[#allocation18_spill]] }
 0x7f0   : > { %p32_p8 = scmp.ge.s32.totalorder %s35_s19, 4   ;;  %s2499_s30 = sld [smem:[#allocation16_spill]] }
 0x7f1   : > { %s2500_s0 = sld [smem:[#allocation17_spill]]  ;;  %s2501_s27 = smov %s1960_s28 }
 0x7f2   : > { %s2502_s28 = smov %s1964_s29  ;;  %34 = sbr.rel (!%p32_p8) target bundleno = 19 (0x13), region = 152 }
 0x7f5   : > { %s2503_s29 = smov %s2498_s10 }
 0x7f7   :  { %1476 = vsyncpa [#allocation7], 1 }
 0x7f8   :  { %1478 = vsyncpa [#allocation7 + $0x1], 1 }
 0x7f9   :  { %1479 = vsyncpa [#allocation10], 1 }
 0x7fa   :  { %1480 = vsyncpa [#allocation8], 1 }
 0x7fb   :  { %1482 = vsyncpa [#allocation8 + $0x1], 1 }

</bundles_post_ra>
